<compile_context>
chip_gen: v7x
topology: tpu7x:2x2x1
jax: 0.10.0
libtpu: 0.0.40
codegen_flags: <defaults>
</compile_context>

<pallas_src>
import numpy as np
import jax
import jax.numpy as jnp
from jax.experimental import pallas as pl
from jax.experimental.pallas import tpu as pltpu

H = 4
W = 4
P = H * W          # 16 flattened pixels (p = h*4 + w)
BN_EPS = 1e-5
TILE_B = 1024      # batch samples per grid step (second-to-last dim, mult. of 8)


# -----------------------------------------------------------------------------
# Pallas kernel: fully folded network on one (TILE_B, 48) batch block.
# -----------------------------------------------------------------------------
def example_model_kernel(
    x_ref,        # (TILE_B, 48) f32   rows = samples, cols = c*16 + h*4 + w
    wpre_ref,     # (48, 16)     bf16  folded pre-ReLU affine (transposed)
    cpre_ref,     # (1, 16)      f32
    wpost_ref,    # (16, 10)     bf16  folded post-ReLU affine (transposed)
    cpost_ref,    # (1, 10)      f32
    out_ref,      # (TILE_B, 10) f32
):
    f32 = jnp.float32
    bf16 = jnp.bfloat16

    x = x_ref[...].astype(bf16)                                           # (TB, 48)
    u = jnp.dot(x, wpre_ref[...], preferred_element_type=f32) + cpre_ref[...]   # (TB, 16)
    r = jnp.maximum(u, 0.0).astype(bf16)
    out_ref[...] = (jnp.dot(r, wpost_ref[...], preferred_element_type=f32)
                    + cpost_ref[...])                                     # (TB, 10)


# -----------------------------------------------------------------------------
# Host-side folding helpers (all float64 for exactness).
# -----------------------------------------------------------------------------
def _shift_mats():
    """G[k, q, p] = 1 iff pixel q is the in-bounds source of output pixel p under tap k."""
    g = np.zeros((9, P, P), np.float64)
    for dy in range(3):
        for dx in range(3):
            k = dy * 3 + dx
            for h in range(H):
                for w in range(W):
                    sh, sw = h + dy - 1, w + dx - 1
                    if 0 <= sh < H and 0 <= sw < W:
                        g[k, sh * W + sw, h * W + w] = 1.0
    return g


_G = _shift_mats()


def _conv_bigw(w):
    """(Co,Ci,3,3) conv weight -> (Co*P, Ci*P) matrix acting on c-major pixel vectors."""
    co, ci = w.shape[0], w.shape[1]
    wk = w.transpose(2, 3, 0, 1).reshape(9, co, ci)                  # tap k = dy*3+dx
    return np.einsum('koi,kqp->opiq', wk, _G).reshape(co * P, ci * P)


def _dw_bigw(w):
    """Depthwise (C,1,3,3) conv weight -> block-diagonal (C*P, C*P) matrix."""
    c = w.shape[0]
    wk = w.reshape(c, 9)
    d = np.einsum('ck,kqp->cpq', wk, _G)                             # (C, P, P)
    big = np.zeros((c * P, c * P), np.float64)
    for i in range(c):
        big[i * P:(i + 1) * P, i * P:(i + 1) * P] = d[i]
    return big


def _pool_mat():
    """(P, 4) matrix implementing AvgPool2d(2,2) + flatten (output index oh*2+ow)."""
    m = np.zeros((P, 4), np.float64)
    for h in range(H):
        for w in range(W):
            m[h * W + w, (h // 2) * 2 + (w // 2)] = 0.25
    return m


def _bn_affine(bn):
    g, b, m, v = (np.asarray(t, np.float64) for t in bn)
    s = g / np.sqrt(v + BN_EPS)
    return s, b - m * s


def init_raw_params(key):
    """Random parameters mirroring the PyTorch module (eval-mode BN stats included)."""
    ks = iter(jax.random.split(key, 64))

    def nrm(shape, scale=0.1):
        return scale * jax.random.normal(next(ks), shape, jnp.float32)

    def conv(co, ci):
        return nrm((co, ci, 3, 3)), nrm((co,))

    def bn(c):
        return (1.0 + nrm((c,)), nrm((c,)), nrm((c,)), jnp.abs(1.0 + nrm((c,))))

    raw = {}
    raw['conv1'] = conv(8, 3)
    raw['bn1'] = bn(8)
    raw['p1'] = nrm((4,), 1.0)                        # torch.randn(1, 1, 1, 4)
    raw['conv2'] = conv(8, 4)
    raw['conv3'] = conv(8, 4)
    raw['bn23'] = bn(16)
    raw['conv4'] = (nrm((16, 1, 3, 3)), nrm((16,)))   # depthwise, groups=16
    raw['bn4'] = bn(16)
    raw['conv5_1'] = conv(16, 16)
    raw['conv5_2'] = conv(16, 16)
    raw['bn5i'] = bn(16)
    raw['bn45'] = bn(32)
    raw['fcp'] = (nrm((32, 32)), nrm((32,)))
    raw['conv6'] = conv(1, 32)
    raw['bn6'] = bn(1)
    raw['p6'] = nrm((), 1.0)                          # torch.randn(1, 1, 1, 1)
    raw['fc'] = (nrm((10, 4)), nrm((10,)))
    return raw


def fold_params(raw):
    """Fold the whole network into (Wpre^T, cpre, Wpost^T, cpost) — float64 compose."""
    npf = lambda t: np.asarray(t, np.float64)
    rep = lambda v: np.repeat(npf(v), P)              # per-channel -> c-major vector

    # conv1 + bn1 + p1 : h1 = A1 x + c1
    w1, b1 = raw['conv1']
    s1, t1 = _bn_affine(raw['bn1'])
    S1, T1 = np.repeat(s1, P), np.repeat(t1, P)
    A1 = S1[:, None] * _conv_bigw(npf(w1))                        # (128, 48)
    p1_vec = np.tile(np.tile(npf(raw['p1']), H), 8)               # p1[w] for every (c, h)
    c1 = S1 * rep(b1) + T1 + p1_vec

    # chunk -> conv2 / conv3 -> cat -> bn23 : z = A23 h1 + c23
    w2, b2 = raw['conv2']
    w3, b3 = raw['conv3']
    A23p = np.zeros((256, 128), np.float64)
    A23p[:128, :64] = _conv_bigw(npf(w2))
    A23p[128:, 64:] = _conv_bigw(npf(w3))
    bias23 = np.concatenate([rep(b2), rep(b3)])
    s23, t23 = _bn_affine(raw['bn23'])
    S23, T23 = np.repeat(s23, P), np.repeat(t23, P)
    A23 = S23[:, None] * A23p
    c23 = S23 * bias23 + T23

    # compose: z = Wz x + cz
    Wz = A23 @ A1                                                 # (256, 48)
    cz = A23 @ c1 + c23

    # bn45 split across the two branches of the concat
    s45, t45 = _bn_affine(raw['bn45'])

    # branch a: depthwise conv4 -> bn4 -> bn45[:16]
    w4, b4 = raw['conv4']
    s4, t4 = _bn_affine(raw['bn4'])
    sa, ta = s45[:16] * s4, s45[:16] * t4 + t45[:16]
    SA, TA = np.repeat(sa, P), np.repeat(ta, P)
    M4 = SA[:, None] * _dw_bigw(npf(w4))
    c4 = SA * rep(b4) + TA
    Wa = M4 @ Wz
    ca = M4 @ cz + c4

    # branch b: conv5_1 ; (+identity) ; conv5_2 -> bn5i -> bn45[16:]
    w51, b51 = raw['conv5_1']
    M51 = _conv_bigw(npf(w51))
    c51 = rep(b51)
    w52, b52 = raw['conv5_2']
    s5i, t5i = _bn_affine(raw['bn5i'])
    sb, tb = s45[16:] * s5i, s45[16:] * t5i + t45[16:]
    SB, TBv = np.repeat(sb, P), np.repeat(tb, P)
    M52 = SB[:, None] * _conv_bigw(npf(w52))
    c52 = SB * rep(b52) + TBv
    Mb = M52 @ (M51 + np.eye(256, dtype=np.float64))              # residual absorbed
    Wb = Mb @ Wz
    cb = Mb @ cz + M52 @ c51 + c52

    # fcp (per-pixel Linear, kron with I_16) -> conv6 -> bn6
    wfcp, bfcp = raw['fcp']
    Kfcp = np.kron(npf(wfcp), np.eye(P, dtype=np.float64))        # (512, 512)
    w6, b6 = raw['conv6']
    W6big = _conv_bigw(npf(w6))                                   # (16, 512)
    s6, t6 = _bn_affine(raw['bn6'])
    W6f = s6[0] * (W6big @ Kfcp)                                  # (16, 512)
    c6 = s6[0] * (W6big @ np.repeat(npf(bfcp), P) + rep(b6)) + t6[0]
    W6a, W6b = W6f[:, :256], W6f[:, 256:]

    # full pre-ReLU affine: u = Wpre x + cpre
    Wpre = W6a @ Wa + W6b @ Wb                                    # (16, 48)
    cpre = W6a @ ca + W6b @ cb + c6                               # (16,)

    # relu -> *p6 -> avgpool(2,2) -> flatten -> fc : out = Wpost relu(u) + cpost
    wfc, bfc = raw['fc']
    Wpost = float(np.asarray(raw['p6'])) * (npf(wfc) @ _pool_mat().T)   # (10, 16)
    cpost = npf(bfc)                                                    # (10,)

    bf16 = jnp.bfloat16
    return (
        jnp.asarray(Wpre.T, bf16),                                # (48, 16)
        jnp.asarray(cpre.reshape(1, -1), jnp.float32),            # (1, 16)
        jnp.asarray(Wpost.T, bf16),                               # (16, 10)
        jnp.asarray(cpost.reshape(1, -1), jnp.float32),           # (1, 10)
    )


# -----------------------------------------------------------------------------
# Wrapper: batch-tiled pallas_call, row-contiguous blocks (no wrapper transpose).
# -----------------------------------------------------------------------------
def example_model_forward(x_nchw, folded, tile_b=TILE_B):
    wpre_t, cpre, wpost_t, cpost = folded
    B = x_nchw.shape[0]
    num_blocks = pl.cdiv(B, tile_b)
    Bp = num_blocks * tile_b

    # NCHW -> (B, C*H*W): column index = c*16 + h*4 + w.  Pure reshape, no transpose.
    x_flat = x_nchw.reshape(B, 3 * P).astype(jnp.float32)
    if Bp != B:
        x_flat = jnp.pad(x_flat, ((0, Bp - B), (0, 0)))

    out = pl.pallas_call(
        example_model_kernel,
        out_shape=jax.ShapeDtypeStruct((Bp, 10), jnp.float32),
        grid=(num_blocks,),
        in_specs=[
            pl.BlockSpec((tile_b, 3 * P), lambda i: (i, 0)),
            pl.BlockSpec(wpre_t.shape, lambda i: (0, 0)),
            pl.BlockSpec(cpre.shape, lambda i: (0, 0)),
            pl.BlockSpec(wpost_t.shape, lambda i: (0, 0)),
            pl.BlockSpec(cpost.shape, lambda i: (0, 0)),
        ],
        out_specs=pl.BlockSpec((tile_b, 10), lambda i: (i, 0)),
        compiler_params=pltpu.CompilerParams(dimension_semantics=("parallel",)),
    )(x_flat, wpre_t, cpre, wpost_t, cpost)
    return out[:B]                                                # (B, 10)


# -----------------------------------------------------------------------------
# Pure-JAX reference mirroring the ORIGINAL (unfolded) module structure, f32.
# -----------------------------------------------------------------------------
def reference_forward(x, raw):
    def conv(x, wb, groups=1):
        w, b = wb
        y = jax.lax.conv_general_dilated(
            x, w, window_strides=(1, 1), padding=((1, 1), (1, 1)),
            dimension_numbers=('NCHW', 'OIHW', 'NCHW'),
            feature_group_count=groups)
        return y + b[None, :, None, None]

    def bn(x, p):
        g, b, m, v = p
        s = g / jnp.sqrt(v + BN_EPS)
        return x * s[None, :, None, None] + (b - m * s)[None, :, None, None]

    B = x.shape[0]
    x = bn(conv(x, raw['conv1']), raw['bn1']) + raw['p1'].reshape(1, 1, 1, 4)
    x1, x2 = x[:, :4], x[:, 4:]
    x = jnp.concatenate([conv(x1, raw['conv2']), conv(x2, raw['conv3'])], axis=1)
    x = bn(x, raw['bn23'])
    identity = x
    a = bn(conv(x, raw['conv4'], groups=16), raw['bn4'])
    b2 = conv(x, raw['conv5_1'])
    b2 = bn(conv(b2 + identity, raw['conv5_2']), raw['bn5i'])
    x = bn(jnp.concatenate([a, b2], axis=1), raw['bn45'])
    x = x.transpose(0, 2, 3, 1).reshape(B, P, 32)
    wfcp, bfcp = raw['fcp']
    x = x @ wfcp.T + bfcp
    x = x.reshape(B, H, W, 32).transpose(0, 3, 1, 2)
    x = jnp.maximum(bn(conv(x, raw['conv6']), raw['bn6']), 0.0) * raw['p6']
    x = x.reshape(B, 1, 2, 2, 2, 2).mean(axis=(3, 5)).reshape(B, 4)
    wfc, bfc = raw['fc']
    return x @ wfc.T + bfc


if __name__ == "__main__":
    key = jax.random.PRNGKey(0)
    kx, kp = jax.random.split(key)
    B = 2048                                   # 2 grid blocks of TILE_B=1024 (even -> both v7x TCs)
    x = jax.random.normal(kx, (B, 3, H, W), jnp.float32)   # NCHW, as in PyTorch
    raw = init_raw_params(kp)
    folded = fold_params(raw)

    out = example_model_forward(x, folded)
    jax.block_until_ready(out)
    assert out.shape == (B, 10) and out.dtype == jnp.float32

    # Tolerance check vs the unfolded f32 reference (kernel uses bf16 MXU operands;
    # the host-side fold itself is exact float64).
    ref = reference_forward(x, raw)
    err = float(jnp.max(jnp.abs(out - ref)))
    scale = float(jnp.max(jnp.abs(ref)))
    assert err <= 5e-2 * scale + 5e-2, (err, scale)
    print("KERNEL_OK")
</pallas_src>

<mosaic_0001>
module attributes {stable_mosaic.version = 11 : i64} {
  func.func @example_model_kernel(%arg0: i32, %arg1: memref<1024x48xf32, #tpu.memory_space<vmem>>, %arg2: memref<48x16xbf16, #tpu.memory_space<vmem>>, %arg3: memref<1x16xf32, #tpu.memory_space<vmem>>, %arg4: memref<16x10xbf16, #tpu.memory_space<vmem>>, %arg5: memref<1x10xf32, #tpu.memory_space<vmem>>, %arg6: memref<1024x10xf32, #tpu.memory_space<vmem>>) attributes {dimension_semantics = [#tpu.dimension_semantics<parallel>], iteration_bounds = array<i64: 2>, scalar_prefetch = 0 : i64, scratch_operands = 0 : i64, tpu.core_type = #tpu.core_type<tc>, window_params = [{transform_indices = @transform_0, window_bounds = array<i64: 1024, 48>}, {pipeline_mode = #tpu.pipeline_mode<synchronous>, transform_indices = @transform_1, window_bounds = array<i64: 48, 16>}, {pipeline_mode = #tpu.pipeline_mode<synchronous>, transform_indices = @transform_2, window_bounds = array<i64: 1, 16>}, {pipeline_mode = #tpu.pipeline_mode<synchronous>, transform_indices = @transform_3, window_bounds = array<i64: 16, 10>}, {pipeline_mode = #tpu.pipeline_mode<synchronous>, transform_indices = @transform_4, window_bounds = array<i64: 1, 10>}, {transform_indices = @transform_5, window_bounds = array<i64: 1024, 10>}]} {
    %c0 = arith.constant 0 : index
    %c0_0 = arith.constant 0 : index
    %0 = vector.load %arg1[%c0, %c0_0] : memref<1024x48xf32, #tpu.memory_space<vmem>>, vector<1024x48xf32>
    %1 = arith.truncf %0 : vector<1024x48xf32> to vector<1024x48xbf16>
    %c0_1 = arith.constant 0 : index
    %c0_2 = arith.constant 0 : index
    %2 = vector.load %arg2[%c0_1, %c0_2] : memref<48x16xbf16, #tpu.memory_space<vmem>>, vector<48x16xbf16>
    %cst = arith.constant dense<0.000000e+00> : vector<1024x16xf32>
    %3 = tpu.matmul %1, %2, %cst {dimension_numbers = #tpu.dot_dimension_numbers<[1], [0], [0], [1], [0, 0, 1, 1], [], []>} : vector<1024x48xbf16>, vector<48x16xbf16>, vector<1024x16xf32> -> vector<1024x16xf32>
    %c0_3 = arith.constant 0 : index
    %c0_4 = arith.constant 0 : index
    %4 = vector.load %arg3[%c0_3, %c0_4] : memref<1x16xf32, #tpu.memory_space<vmem>>, vector<1x16xf32>
    %5 = vector.broadcast %4 : vector<1x16xf32> to vector<1024x16xf32>
    %6 = arith.addf %3, %5 : vector<1024x16xf32>
    %cst_5 = arith.constant 0.000000e+00 : f32
    %7 = vector.broadcast %cst_5 : f32 to vector<1024x16xf32>
    %8 = arith.maximumf %6, %7 : vector<1024x16xf32>
    %9 = arith.truncf %8 : vector<1024x16xf32> to vector<1024x16xbf16>
    %c0_6 = arith.constant 0 : index
    %c0_7 = arith.constant 0 : index
    %10 = vector.load %arg4[%c0_6, %c0_7] : memref<16x10xbf16, #tpu.memory_space<vmem>>, vector<16x10xbf16>
    %cst_8 = arith.constant dense<0.000000e+00> : vector<1024x10xf32>
    %11 = tpu.matmul %9, %10, %cst_8 {dimension_numbers = #tpu.dot_dimension_numbers<[1], [0], [0], [1], [0, 0, 1, 1], [], []>} : vector<1024x16xbf16>, vector<16x10xbf16>, vector<1024x10xf32> -> vector<1024x10xf32>
    %c0_9 = arith.constant 0 : index
    %c0_10 = arith.constant 0 : index
    %12 = vector.load %arg5[%c0_9, %c0_10] : memref<1x10xf32, #tpu.memory_space<vmem>>, vector<1x10xf32>
    %13 = vector.broadcast %12 : vector<1x10xf32> to vector<1024x10xf32>
    %14 = arith.addf %11, %13 : vector<1024x10xf32>
    %c0_11 = arith.constant 0 : index
    %c0_12 = arith.constant 0 : index
    %15 = vector.load %arg6[%c0_11, %c0_12] : memref<1024x10xf32, #tpu.memory_space<vmem>>, vector<1024x10xf32>
    tpu.vector_store %arg6[%c0_11, %c0_12], %14 {strides = array<i32>} : memref<1024x10xf32, #tpu.memory_space<vmem>>, vector<1024x10xf32>,
    return
  }
  func.func @transform_0(%arg0: i32) -> (i32, i32) {
    %c0_i32 = arith.constant 0 : i32
    %c0_i32_0 = arith.constant 0 : i32
    return %arg0, %c0_i32 : i32, i32
  }
  func.func @transform_1(%arg0: i32) -> (i32, i32) {
    %c0_i32 = arith.constant 0 : i32
    %c0_i32_0 = arith.constant 0 : i32
    %c0_i32_1 = arith.constant 0 : i32
    return %c0_i32, %c0_i32_0 : i32, i32
  }
  func.func @transform_2(%arg0: i32) -> (i32, i32) {
    %c0_i32 = arith.constant 0 : i32
    %c0_i32_0 = arith.constant 0 : i32
    %c0_i32_1 = arith.constant 0 : i32
    return %c0_i32, %c0_i32_0 : i32, i32
  }
  func.func @transform_3(%arg0: i32) -> (i32, i32) {
    %c0_i32 = arith.constant 0 : i32
    %c0_i32_0 = arith.constant 0 : i32
    %c0_i32_1 = arith.constant 0 : i32
    return %c0_i32, %c0_i32_0 : i32, i32
  }
  func.func @transform_4(%arg0: i32) -> (i32, i32) {
    %c0_i32 = arith.constant 0 : i32
    %c0_i32_0 = arith.constant 0 : i32
    %c0_i32_1 = arith.constant 0 : i32
    return %c0_i32, %c0_i32_0 : i32, i32
  }
  func.func @transform_5(%arg0: i32) -> (i32, i32) {
    %c0_i32 = arith.constant 0 : i32
    %c0_i32_0 = arith.constant 0 : i32
    return %arg0, %c0_i32 : i32, i32
  }
}

</mosaic_0001>

<bundles_post_ra>
// kernel: tpu_custom_call.1
= control target key start
LH: loop header
LB: loop body
LE: loop exit
PB: predicated region body
PF: predicated region fallthrough
CT: control target
= control target key end

     0   :  { %s2912_s18 = smov 0   ;;  %s3735_s0 = inlined_call_operand.vmem [shape: f32[2048,48], index: 0, kind: input, shape index: {}]   ;;  %s3736_s1 = inlined_call_operand.vmem [shape: bf16[48,16], index: 1, kind: input, shape index: {}]   ;;  %s3737_s2 = inlined_call_operand.vmem [shape: f32[1,16], index: 2, kind: input, shape index: {}]   ;;  %s3738_s3 = inlined_call_operand.vmem [shape: bf16[16,10], index: 3, kind: input, shape index: {}]   ;;  %s3739_s4 = inlined_call_operand.vmem [shape: f32[1,10], index: 4, kind: input, shape index: {}]   ;;  %s3740_s5 = inlined_call_operand.vmem [shape: f32[2048,10], index: 5, kind: output, shape index: {}]  }
   0x1 LB: > { %s2320_s19 = sadd.s32 4294967295, %s2880_s18   ;;  %p2324_p0 = scmp.ge.s32.totalorder %s2880_s18, 1  ;;  %s2880_s18 = sphi %s2912_s18, %s15_s18  }
   0x2   : > { %p188_p1 = scmp.lt.s32.totalorder %s2880_s18, 3 }
   0x4   : > { %p189_p2 = pnand %p2324_p0, %p188_p1 }
   0x5   : > { %v2869_v0 = vld [vmem:[%s3736_s1] sm:$0xff] (!%p189_p2)   ;;  %s2325_s22 = sshll.u32 (!%p189_p2), %s2320_s19, 7  ;;  %v2870_v1 = vld [vmem:[%s3736_s1 + $0x8] sm:$0xff] (!%p189_p2)   ;;  %v2871_v2 = vld [vmem:[%s3736_s1 + $0x10] sm:$0xff] (!%p189_p2)   ;;  %vm452_vm0 = vcmask (!%p189_p2), 392192   ;;  %vm1397_vm1 = vcmask (!%p189_p2), 130048  }
   0x6   : > { %192 = sbr.rel (%p189_p2) target bundleno = 708 (0x2c4), region = 40  ;;  %p217_p3 = scmp.lt.s32.totalorder (!%p189_p2), %s2325_s22, 255  ;;  %2597 = vmatprep.subr.bf16.mxu0 (!%p189_p2), %v2869_v0  ;;  %vm2135_vm2 = vcmask (!%p189_p2), 80896  }
   0x7   : > { %2598 = vmatpush3.bf16.msra.mxu0 (!%p189_p2), %v2869_v0 }
   0x8   : > { %2599 = vmatprep.subr.bf16.mxu0 (!%p189_p2), %v2870_v1 }
   0xb   : > { %2600 = vmatpush3.bf16.msra.mxu0 (!%p189_p2), %v2870_v1 }
   0xc   : > { %2601 = vmatprep.subr.bf16.mxu0 (!%p189_p2), %v2871_v2 }
   0xd   : > { %s3742_s22 = smov (!%p217_p3, %s2325_s22), 255 }
   0xe   : > { %s2326_s27 = sshll.u32 %s3742_s22, 3 }
   0xf   : > { %s2937_s30 = scalar_lea.vmem %s3735_s0, %s2326_s27  ;;  %2602 = vmatpush3.bf16.msra.mxu0 %v2871_v2  ;;  %s3315_s14 = scalar_lea.vmem %s3740_s5, %s2326_s27 }
  0x10   : > { %v229_v3 = vld [vmem:[%s2937_s30] sm:$0xff]  ;;  %v230_v4 = vld [vmem:[%s2937_s30 + $0x8] sm:$0xff]  ;;  %v231_v5 = vld [vmem:[%s2937_s30 + $0x10] sm:$0xff] }
  0x11   : > { %v357_v6 = vpack.c.bf16 %v230_v4, %v229_v3  ;;  %v232_v7 = vld [vmem:[%s2937_s30 + $0x18] sm:$0xff]  ;;  %v233_v8 = vld [vmem:[%s2937_s30 + $0x20] sm:$0xff]  ;;  %v234_v9 = vld [vmem:[%s2937_s30 + $0x28] sm:$0xff] }
  0x12   : > { %v358_v10 = vpack.c.bf16 %v232_v7, %v231_v5  ;;  %v359_v11 = vpack.c.bf16 %v234_v9, %v233_v8  ;;  %v235_v12 = vld [vmem:[%s2937_s30 + $0x30] sm:$0xff]  ;;  %v236_v13 = vld [vmem:[%s2937_s30 + $0x38] sm:$0xff]  ;;  %v237_v14 = vld [vmem:[%s2937_s30 + $0x40] sm:$0xff] }
  0x13   : > { %2603 = vmatprep.mubr.msk.bf16.mxu0 %vm452_vm0, %v357_v6  ;;  %v238_v15 = vld [vmem:[%s2937_s30 + $0x48] sm:$0xff]  ;;  %v360_v16 = vpack.c.bf16 %v236_v13, %v235_v12  ;;  %v239_v18 = vld [vmem:[%s2937_s30 + $0x50] sm:$0xff]  ;;  %v240_v19 = vld [vmem:[%s2937_s30 + $0x58] sm:$0xff] }
  0x14   : > { %2604 = vmatmul.mubr.msk.bf16.vlgmr.msra.gmra.mrb[0].mxu0 %vm452_vm0, %v358_v10  ;;  %v361_v17 = vpack.c.bf16 %v238_v15, %v237_v14  ;;  %v241_v20 = vld [vmem:[%s2937_s30 + $0x60] sm:$0xff]  ;;  %v242_v21 = vld [vmem:[%s2937_s30 + $0x68] sm:$0xff]  ;;  %v362_v22 = vpack.c.bf16 %v240_v19, %v239_v18  ;;  %v243_v24 = vld [vmem:[%s2937_s30 + $0x70] sm:$0xff] }
  0x15   : > { %2607 = vmatprep.mubr.msk.bf16.mxu0 %vm452_vm0, %v359_v11  ;;  %v363_v23 = vpack.c.bf16 %v242_v21, %v241_v20  ;;  %v244_v25 = vld [vmem:[%s2937_s30 + $0x78] sm:$0xff]  ;;  %v245_v26 = vld [vmem:[%s2937_s30 + $0x80] sm:$0xff]  ;;  %v246_v27 = vld [vmem:[%s2937_s30 + $0x88] sm:$0xff] }
  0x16   : > { %v364_v28 = vpack.c.bf16 %v244_v25, %v243_v24  ;;  %v365_v29 = vpack.c.bf16 %v246_v27, %v245_v26  ;;  %v247_v30 = vld [vmem:[%s2937_s30 + $0x90] sm:$0xff]  ;;  %v248_v31 = vld [vmem:[%s2937_s30 + $0x98] sm:$0xff]  ;;  %v249_v32 = vld [vmem:[%s2937_s30 + $0xa0] sm:$0xff] }
  0x17   : > { %v250_v33 = vld [vmem:[%s2937_s30 + $0xa8] sm:$0xff]  ;;  %v366_v34 = vpack.c.bf16 %v248_v31, %v247_v30  ;;  %v251_v36 = vld [vmem:[%s2937_s30 + $0xb0] sm:$0xff]  ;;  %v252_v37 = vld [vmem:[%s2937_s30 + $0xb8] sm:$0xff] }
  0x18   : > { %v367_v35 = vpack.c.bf16 %v250_v33, %v249_v32  ;;  %v253_v38 = vld [vmem:[%s2937_s30 + $0xc0] sm:$0xff]  ;;  %v254_v39 = vld [vmem:[%s2937_s30 + $0xc8] sm:$0xff]  ;;  %v368_v40 = vpack.c.bf16 %v252_v37, %v251_v36  ;;  %v255_v42 = vld [vmem:[%s2937_s30 + $0xd0] sm:$0xff] }
  0x19   : > { %v369_v41 = vpack.c.bf16 %v254_v39, %v253_v38  ;;  %v256_v43 = vld [vmem:[%s2937_s30 + $0xd8] sm:$0xff]  ;;  %v257_v44 = vld [vmem:[%s2937_s30 + $0xe0] sm:$0xff]  ;;  %v258_v45 = vld [vmem:[%s2937_s30 + $0xe8] sm:$0xff] }
  0x1a   : > { %v370_v46 = vpack.c.bf16 %v256_v43, %v255_v42  ;;  %v371_v47 = vpack.c.bf16 %v258_v45, %v257_v44  ;;  %v259_v48 = vld [vmem:[%s2937_s30 + $0xf0] sm:$0xff]  ;;  %v260_v49 = vld [vmem:[%s2937_s30 + $0xf8] sm:$0xff]  ;;  %v261_v50 = vld [vmem:[%s2937_s30 + $0x100] sm:$0xff] }
  0x1b   : > { %v262_v51 = vld [vmem:[%s2937_s30 + $0x108] sm:$0xff]  ;;  %v372_v52 = vpack.c.bf16 %v260_v49, %v259_v48  ;;  %v263_v54 = vld [vmem:[%s2937_s30 + $0x110] sm:$0xff]  ;;  %v264_v55 = vld [vmem:[%s2937_s30 + $0x118] sm:$0xff] }
  0x1c   : > { %2608 = vmatmul.mubr.msk.bf16.gmra.mrb[4].mxu0 %vm452_vm0, %v360_v16  ;;  %v373_v53 = vpack.c.bf16 %v262_v51, %v261_v50  ;;  %v265_v56 = vld [vmem:[%s2937_s30 + $0x120] sm:$0xff]  ;;  %v266_v57 = vld [vmem:[%s2937_s30 + $0x128] sm:$0xff]  ;;  %v374_v58 = vpack.c.bf16 %v264_v55, %v263_v54  ;;  %v267_v60 = vld [vmem:[%s2937_s30 + $0x130] sm:$0xff] }
  0x1d   : > { %2611 = vmatprep.mubr.msk.bf16.mxu0 %vm452_vm0, %v361_v17  ;;  %v375_v59 = vpack.c.bf16 %v266_v57, %v265_v56  ;;  %v268_v61 = vld [vmem:[%s2937_s30 + $0x138] sm:$0xff]  ;;  %v269_v62 = vld [vmem:[%s2937_s30 + $0x140] sm:$0xff]  ;;  %v270_v63 = vld [vmem:[%s2937_s30 + $0x148] sm:$0xff] }
  0x1e   : > { %v376_v0 = vpack.c.bf16 %v268_v61, %v267_v60  ;;  %v377_v1 = vpack.c.bf16 %v270_v63, %v269_v62  ;;  %v271_v2 = vld [vmem:[%s2937_s30 + $0x150] sm:$0xff]  ;;  %v272_v3 = vld [vmem:[%s2937_s30 + $0x158] sm:$0xff]  ;;  %v273_v4 = vld [vmem:[%s2937_s30 + $0x160] sm:$0xff] }
  0x1f   : > { %v274_v5 = vld [vmem:[%s2937_s30 + $0x168] sm:$0xff]  ;;  %v378_v6 = vpack.c.bf16 %v272_v3, %v271_v2  ;;  %v275_v8 = vld [vmem:[%s2937_s30 + $0x170] sm:$0xff]  ;;  %v276_v9 = vld [vmem:[%s2937_s30 + $0x178] sm:$0xff] }
  0x20   : > { %v379_v7 = vpack.c.bf16 %v274_v5, %v273_v4  ;;  %v277_v10 = vld [vmem:[%s2937_s30 + $0x180] sm:$0xff]  ;;  %v278_v11 = vld [vmem:[%s2937_s30 + $0x188] sm:$0xff]  ;;  %v380_v12 = vpack.c.bf16 %v276_v9, %v275_v8  ;;  %v279_v15 = vld [vmem:[%s2937_s30 + $0x190] sm:$0xff] }
  0x21   : > { %v381_v13 = vpack.c.bf16 %v278_v11, %v277_v10  ;;  %v2872_v14 = vld [vmem:[%s3738_s3] sm:$0xff]   ;;  %v280_v16 = vld [vmem:[%s2937_s30 + $0x198] sm:$0xff]  ;;  %v282_v18 = vld [vmem:[%s2937_s30 + $0x1a8] sm:$0xff] }
  0x22   : > { %v281_v17 = vld [vmem:[%s2937_s30 + $0x1a0] sm:$0xff]  ;;  %2731 = vmatprep.subr.bf16.mxu1 %v2872_v14  ;;  %v382_v19 = vpack.c.bf16 %v280_v16, %v279_v15  ;;  %v283_v21 = vld [vmem:[%s2937_s30 + $0x1b0] sm:$0xff]  ;;  %v286_v24 = vld [vmem:[%s2937_s30 + $0x1c8] sm:$0xff] }
  0x23   : > { %2732 = vmatpush3.bf16.msra.mxu1 %v2872_v14  ;;  %v383_v20 = vpack.c.bf16 %v282_v18, %v281_v17  ;;  %v287_v27 = vld [vmem:[%s2937_s30 + $0x1d0] sm:$0xff]  ;;  %v290_v30 = vld [vmem:[%s2937_s30 + $0x1e8] sm:$0xff]  ;;  %v324_v18 = vld [vmem:[%s2937_s30 + $0x2f8] sm:$0xff] }
  0x24   : > { %2612 = vmatmul.mubr.msk.bf16.gmra.mrb[8].mxu0 %vm452_vm0, %v362_v22  ;;  %v284_v22 = vld [vmem:[%s2937_s30 + $0x1b8] sm:$0xff]  ;;  %v291_v33 = vld [vmem:[%s2937_s30 + $0x1f0] sm:$0xff]  ;;  %v294_v36 = vld [vmem:[%s2937_s30 + $0x208] sm:$0xff] }
  0x25   : > { %2615 = vmatprep.mubr.msk.bf16.mxu0 %vm452_vm0, %v363_v23  ;;  %v285_v23 = vld [vmem:[%s2937_s30 + $0x1c0] sm:$0xff]  ;;  %v384_v25 = vpack.c.bf16 %v284_v22, %v283_v21  ;;  %v295_v39 = vld [vmem:[%s2937_s30 + $0x210] sm:$0xff]  ;;  %v298_v42 = vld [vmem:[%s2937_s30 + $0x228] sm:$0xff] }
  0x26   : > { %v385_v26 = vpack.c.bf16 %v286_v24, %v285_v23  ;;  %v299_v45 = vld [vmem:[%s2937_s30 + $0x230] sm:$0xff]  ;;  %v302_v48 = vld [vmem:[%s2937_s30 + $0x248] sm:$0xff]  ;;  %v328_v24 = vld [vmem:[%s2937_s30 + $0x318] sm:$0xff] }
  0x27   : > { %v303_v51 = vld [vmem:[%s2937_s30 + $0x250] sm:$0xff]  ;;  %v306_v54 = vld [vmem:[%s2937_s30 + $0x268] sm:$0xff] }
  0x28   : > { %v307_v57 = vld [vmem:[%s2937_s30 + $0x270] sm:$0xff]  ;;  %v310_v60 = vld [vmem:[%s2937_s30 + $0x288] sm:$0xff] }
  0x29   : > { %v311_v63 = vld [vmem:[%s2937_s30 + $0x290] sm:$0xff]  ;;  %v314_v2 = vld [vmem:[%s2937_s30 + $0x2a8] sm:$0xff] }
  0x2a   : > { %v315_v5 = vld [vmem:[%s2937_s30 + $0x2b0] sm:$0xff]  ;;  %v318_v8 = vld [vmem:[%s2937_s30 + $0x2c8] sm:$0xff] }
  0x2b   : > { %v319_v11 = vld [vmem:[%s2937_s30 + $0x2d0] sm:$0xff]  ;;  %v322_v14 = vld [vmem:[%s2937_s30 + $0x2e8] sm:$0xff] }
  0x2c   : > { %2616 = vmatmul.mubr.msk.bf16.gmra.mrb[12].mxu0 %vm452_vm0, %v364_v28  ;;  %v288_v28 = vld [vmem:[%s2937_s30 + $0x1d8] sm:$0xff]  ;;  %v323_v17 = vld [vmem:[%s2937_s30 + $0x2f0] sm:$0xff] }
  0x2d   : > { %2619 = vmatprep.mubr.msk.bf16.mxu0 %vm452_vm0, %v365_v29  ;;  %v289_v29 = vld [vmem:[%s2937_s30 + $0x1e0] sm:$0xff]  ;;  %v386_v31 = vpack.c.bf16 %v288_v28, %v287_v27  ;;  %v404_v21 = vpack.c.bf16 %v324_v18, %v323_v17  ;;  %v327_v23 = vld [vmem:[%s2937_s30 + $0x310] sm:$0xff]  ;;  %v348_v17 = vld [vmem:[%s2937_s30 + $0x3b8] sm:$0xff] }
  0x2e   : > { %v387_v32 = vpack.c.bf16 %v290_v30, %v289_v29  ;;  %v406_v27 = vpack.c.bf16 %v328_v24, %v327_v23  ;;  %v331_v29 = vld [vmem:[%s2937_s30 + $0x330] sm:$0xff]  ;;  %v332_v30 = vld [vmem:[%s2937_s30 + $0x338] sm:$0xff] }
  0x34   : > { %2620 = vmatmul.mubr.msk.bf16.gmra.mrb[16].mxu0 %vm452_vm0, %v366_v34  ;;  %v292_v34 = vld [vmem:[%s2937_s30 + $0x1f8] sm:$0xff] }
  0x35   : > { %2623 = vmatprep.mubr.msk.bf16.mxu0 %vm452_vm0, %v367_v35  ;;  %v293_v35 = vld [vmem:[%s2937_s30 + $0x200] sm:$0xff]  ;;  %v388_v37 = vpack.c.bf16 %v292_v34, %v291_v33  ;;  %v408_v33 = vpack.c.bf16 %v332_v30, %v331_v29 }
  0x36   : > { %v389_v38 = vpack.c.bf16 %v294_v36, %v293_v35  ;;  %v335_v35 = vld [vmem:[%s2937_s30 + $0x350] sm:$0xff]  ;;  %v336_v36 = vld [vmem:[%s2937_s30 + $0x358] sm:$0xff] }
  0x3c   : > { %2624 = vmatmul.mubr.msk.bf16.gmra.mrb[20].mxu0 %vm452_vm0, %v368_v40  ;;  %v296_v40 = vld [vmem:[%s2937_s30 + $0x218] sm:$0xff] }
  0x3d   : > { %2627 = vmatprep.mubr.msk.bf16.mxu0 %vm452_vm0, %v369_v41  ;;  %v297_v41 = vld [vmem:[%s2937_s30 + $0x220] sm:$0xff]  ;;  %v390_v43 = vpack.c.bf16 %v296_v40, %v295_v39  ;;  %v410_v39 = vpack.c.bf16 %v336_v36, %v335_v35  ;;  %v351_v36 = vld [vmem:[%s2937_s30 + $0x3d0] sm:$0xff] }
  0x3e   : > { %v391_v44 = vpack.c.bf16 %v298_v42, %v297_v41  ;;  %v3109_v41 = vld [vmem:[%s3737_s2] ss:$0 sm:$0xff]  ;;  %v339_v42 = vld [vmem:[%s2937_s30 + $0x370] sm:$0xff] }
  0x44   : > { %2628 = vmatmul.mubr.msk.bf16.gmra.mrb[24].mxu0 %vm452_vm0, %v370_v46  ;;  %v300_v46 = vld [vmem:[%s2937_s30 + $0x238] sm:$0xff] }
  0x45   : > { %2631 = vmatprep.mubr.msk.bf16.mxu0 %vm452_vm0, %v371_v47  ;;  %v301_v47 = vld [vmem:[%s2937_s30 + $0x240] sm:$0xff]  ;;  %v392_v49 = vpack.c.bf16 %v300_v46, %v299_v45  ;;  %v342_v45 = vld [vmem:[%s2937_s30 + $0x388] sm:$0xff] }
  0x46   : > { %v393_v50 = vpack.c.bf16 %v302_v48, %v301_v47 }
  0x4c   : > { %2632 = vmatmul.mubr.msk.bf16.gmra.mrb[28].mxu0 %vm452_vm0, %v372_v52  ;;  %v304_v52 = vld [vmem:[%s2937_s30 + $0x258] sm:$0xff] }
  0x4d   : > { %2635 = vmatprep.mubr.msk.bf16.mxu0 %vm452_vm0, %v373_v53  ;;  %v305_v53 = vld [vmem:[%s2937_s30 + $0x260] sm:$0xff]  ;;  %v394_v55 = vpack.c.bf16 %v304_v52, %v303_v51 }
  0x4e   : > { %v395_v56 = vpack.c.bf16 %v306_v54, %v305_v53 }
  0x54   : > { %2636 = vmatmul.mubr.msk.bf16.gmra.mrb[32].mxu0 %vm452_vm0, %v374_v58  ;;  %v308_v58 = vld [vmem:[%s2937_s30 + $0x278] sm:$0xff] }
  0x55   : > { %2639 = vmatprep.mubr.msk.bf16.mxu0 %vm452_vm0, %v375_v59  ;;  %v309_v59 = vld [vmem:[%s2937_s30 + $0x280] sm:$0xff]  ;;  %v396_v61 = vpack.c.bf16 %v308_v58, %v307_v57 }
  0x56   : > { %v397_v62 = vpack.c.bf16 %v310_v60, %v309_v59  ;;  %v343_v60 = vld [vmem:[%s2937_s30 + $0x390] sm:$0xff] }
  0x5c   : > { %2640 = vmatmul.mubr.msk.bf16.gmra.mrb[36].mxu0 %vm452_vm0, %v376_v0  ;;  %v312_v0 = vld [vmem:[%s2937_s30 + $0x298] sm:$0xff] }
  0x5d   : > { %2643 = vmatprep.mubr.msk.bf16.mxu0 %vm452_vm0, %v377_v1  ;;  %v313_v1 = vld [vmem:[%s2937_s30 + $0x2a0] sm:$0xff]  ;;  %v398_v3 = vpack.c.bf16 %v312_v0, %v311_v63  ;;  %v346_v0 = vld [vmem:[%s2937_s30 + $0x3a8] sm:$0xff] }
  0x5e   : > { %v399_v4 = vpack.c.bf16 %v314_v2, %v313_v1  ;;  %v345_v63 = vld [vmem:[%s2937_s30 + $0x3a0] sm:$0xff] }
  0x64   : > { %2644 = vmatmul.mubr.msk.bf16.gmra.mrb[40].mxu0 %vm452_vm0, %v378_v6  ;;  %v316_v6 = vld [vmem:[%s2937_s30 + $0x2b8] sm:$0xff] }
  0x65   : > { %2647 = vmatprep.mubr.msk.bf16.mxu0 %vm452_vm0, %v379_v7  ;;  %v317_v7 = vld [vmem:[%s2937_s30 + $0x2c0] sm:$0xff]  ;;  %v400_v9 = vpack.c.bf16 %v316_v6, %v315_v5 }
  0x66   : > { %v401_v10 = vpack.c.bf16 %v318_v8, %v317_v7  ;;  %v415_v8 = vpack.c.bf16 %v346_v0, %v345_v63 }
  0x6c   : > { %2648 = vmatmul.mubr.msk.bf16.gmra.mrb[44].mxu0 %vm452_vm0, %v380_v12  ;;  %v320_v12 = vld [vmem:[%s2937_s30 + $0x2d8] sm:$0xff] }
  0x6d   : > { %2651 = vmatprep.mubr.msk.bf16.mxu0 %vm452_vm0, %v381_v13  ;;  %v321_v13 = vld [vmem:[%s2937_s30 + $0x2e0] sm:$0xff]  ;;  %v402_v15 = vpack.c.bf16 %v320_v12, %v319_v11 }
  0x6e   : > { %v403_v16 = vpack.c.bf16 %v322_v14, %v321_v13 }
  0x74   : > { %2652 = vmatmul.mubr.msk.bf16.gmra.mrb[48].mxu0 %vm452_vm0, %v382_v19  ;;  %v325_v19 = vld [vmem:[%s2937_s30 + $0x300] sm:$0xff] }
  0x75   : > { %2655 = vmatprep.mubr.msk.bf16.mxu0 %vm452_vm0, %v383_v20  ;;  %v326_v20 = vld [vmem:[%s2937_s30 + $0x308] sm:$0xff] }
  0x76   : > { %v405_v22 = vpack.c.bf16 %v326_v20, %v325_v19  ;;  %v349_v19 = vld [vmem:[%s2937_s30 + $0x3c0] sm:$0xff]  ;;  %v350_v20 = vld [vmem:[%s2937_s30 + $0x3c8] sm:$0xff] }
  0x7c   : > { %2656 = vmatmul.mubr.msk.bf16.gmra.mrb[52].mxu0 %vm452_vm0, %v384_v25  ;;  %v329_v25 = vld [vmem:[%s2937_s30 + $0x320] sm:$0xff] }
  0x7d   : > { %2659 = vmatprep.mubr.msk.bf16.mxu0 %vm452_vm0, %v385_v26  ;;  %v330_v26 = vld [vmem:[%s2937_s30 + $0x328] sm:$0xff] }
  0x7e   : > { %v407_v28 = vpack.c.bf16 %v330_v26, %v329_v25 }
  0x84   : > { %2660 = vmatmul.mubr.msk.bf16.gmra.mrb[56].mxu0 %vm452_vm0, %v386_v31  ;;  %v333_v31 = vld [vmem:[%s2937_s30 + $0x340] sm:$0xff] }
  0x85   : > { %2663 = vmatprep.mubr.msk.bf16.mxu0 %vm452_vm0, %v387_v32  ;;  %v334_v32 = vld [vmem:[%s2937_s30 + $0x348] sm:$0xff] }
  0x86   : > { %v409_v34 = vpack.c.bf16 %v334_v32, %v333_v31 }
  0x8c   : > { %2664 = vmatmul.mubr.msk.bf16.gmra.mrb[60].mxu0 %vm452_vm0, %v388_v37  ;;  %v337_v37 = vld [vmem:[%s2937_s30 + $0x360] sm:$0xff] }
  0x8d   : > { %2667 = vmatprep.mubr.msk.bf16.mxu0 %vm452_vm0, %v389_v38  ;;  %v338_v38 = vld [vmem:[%s2937_s30 + $0x368] sm:$0xff] }
  0x8e   : > { %v411_v40 = vpack.c.bf16 %v338_v38, %v337_v37  ;;  %v352_v37 = vld [vmem:[%s2937_s30 + $0x3d8] sm:$0xff] }
  0x94   : > { %2668 = vmatmul.mubr.msk.bf16.gmra.mrb[64].mxu0 %vm452_vm0, %v390_v43  ;;  %v340_v43 = vld [vmem:[%s2937_s30 + $0x378] sm:$0xff] }
  0x95   : > { %2671 = vmatprep.mubr.msk.bf16.mxu0 %vm452_vm0, %v391_v44  ;;  %v341_v44 = vld [vmem:[%s2937_s30 + $0x380] sm:$0xff] }
  0x96   : > { %v413_v52 = vpack.c.bf16 %v342_v45, %v341_v44 }
  0x9c   : > { %2672 = vmatmul.mubr.msk.bf16.gmra.mrb[68].mxu0 %vm452_vm0, %v392_v49  ;;  %v412_v49 = vpack.c.bf16 %v340_v43, %v339_v42 }
  0x9d   : > { %2675 = vmatprep.mubr.msk.bf16.mxu0 %vm452_vm0, %v393_v50 }
  0xa4   : > { %2676 = vmatmul.mubr.msk.bf16.gmra.mrb[72].mxu0 %vm452_vm0, %v394_v55 }
  0xa5   : > { %2679 = vmatprep.mubr.msk.bf16.mxu0 %vm452_vm0, %v395_v56 }
  0xac   : > { %2680 = vmatmul.mubr.msk.bf16.gmra.mrb[76].mxu0 %vm452_vm0, %v396_v61  ;;  %v344_v61 = vld [vmem:[%s2937_s30 + $0x398] sm:$0xff] }
  0xad   : > { %2683 = vmatprep.mubr.msk.bf16.mxu0 %vm452_vm0, %v397_v62  ;;  %v414_v5 = vpack.c.bf16 %v344_v61, %v343_v60 }
  0xb4   : > { %2684 = vmatmul.mubr.msk.bf16.gmra.mrb[80].mxu0 %vm452_vm0, %v398_v3 }
  0xb5   : > { %2687 = vmatprep.mubr.msk.bf16.mxu0 %vm452_vm0, %v399_v4 }
  0xbc   : > { %2688 = vmatmul.mubr.msk.bf16.gmra.mrb[84].mxu0 %vm452_vm0, %v400_v9 }
  0xbd   : > { %2691 = vmatprep.mubr.msk.bf16.mxu0 %vm452_vm0, %v401_v10 }
  0xc4   : > { %2692 = vmatmul.mubr.msk.bf16.gmra.mrb[88].mxu0 %vm452_vm0, %v402_v15 }
  0xc5   : > { %2695 = vmatprep.mubr.msk.bf16.mxu0 %vm452_vm0, %v403_v16  ;;  %v347_v16 = vld [vmem:[%s2937_s30 + $0x3b0] sm:$0xff] }
  0xc6   : > { %v416_v25 = vpack.c.bf16 %v348_v17, %v347_v16 }
  0xcc   : > { %2696 = vmatmul.mubr.msk.bf16.gmra.mrb[92].mxu0 %vm452_vm0, %v404_v21 }
  0xcd   : > { %2699 = vmatprep.mubr.msk.bf16.mxu0 %vm452_vm0, %v405_v22 }
  0xd4   : > { %2700 = vmatmul.mubr.msk.bf16.gmra.mrb[96].mxu0 %vm452_vm0, %v406_v27 }
  0xd5   : > { %2703 = vmatprep.mubr.msk.bf16.mxu0 %vm452_vm0, %v407_v28  ;;  %v417_v28 = vpack.c.bf16 %v350_v20, %v349_v19 }
  0xdc   : > { %2704 = vmatmul.mubr.msk.bf16.gmra.mrb[100].mxu0 %vm452_vm0, %v408_v33 }
  0xdd   : > { %2707 = vmatprep.mubr.msk.bf16.mxu0 %vm452_vm0, %v409_v34 }
  0xe4   : > { %2708 = vmatmul.mubr.msk.bf16.gmra.mrb[104].mxu0 %vm452_vm0, %v410_v39  ;;  %v353_v39 = vld [vmem:[%s2937_s30 + $0x3e0] sm:$0xff] }
  0xe5   : > { %2711 = vmatprep.mubr.msk.bf16.mxu0 %vm452_vm0, %v411_v40  ;;  %v354_v40 = vld [vmem:[%s2937_s30 + $0x3e8] sm:$0xff] }
  0xe7   : > { %v2605_v46 = vpop.f32.mrb[0].mxu0 }
  0xe8   : > { %v688_v47 = vadd.f32 %v2605_v46, %v3109_v41  ;;  %v679_v48 = vpop.f32.mrb[1].mxu0  ;;  %v418_v46 = vpack.c.bf16 %v352_v37, %v351_v36 }
  0xe9   : > { %v680_v50 = vadd.f32 %v3109_v41, %v679_v48  ;;  %v2606_v51 = vpop.f32.mrb[2].mxu0 }
  0xea   : > { %v691_v53 = vadd.f32 %v2606_v51, %v3109_v41  ;;  %v682_v54 = vpop.f32.mrb[3].mxu0  ;;  %v1192_v56 = vmax.f32 %v688_v47, 0.0 }
  0xeb   : > { %v683_v55 = vadd.f32 %v3109_v41, %v682_v54  ;;  %v1190_v58 = vmax.f32 %v680_v50, 0.0 }
  0xec   : > { %v1193_v57 = vmax.f32 %v691_v53, 0.0  ;;  %2712 = vmatmul.mubr.msk.bf16.gmra.mrb[108].mxu0 %vm452_vm0, %v412_v49  ;;  %v419_v49 = vpack.c.bf16 %v354_v40, %v353_v39 }
  0xed   : > { %v1191_v59 = vmax.f32 %v683_v55, 0.0  ;;  %2715 = vmatprep.mubr.msk.bf16.mxu0 %vm452_vm0, %v413_v52 }
  0xee   : > { %v1319_v62 = vpack.c.bf16 %v1193_v57, %v1192_v56  ;;  %v355_v57 = vld [vmem:[%s2937_s30 + $0x3f0] sm:$0xff] }
  0xef   : > { %v2609_v1 = vpop.f32.mrb[4].mxu0  ;;  %v1318_v2 = vpack.c.bf16 %v1191_v59, %v1190_v58  ;;  %v356_v58 = vld [vmem:[%s2937_s30 + $0x3f8] sm:$0xff] }
  0xf0   : > { %v704_v3 = vadd.f32 %v2609_v1, %v3109_v41  ;;  %v695_v4 = vpop.f32.mrb[5].mxu0  ;;  %v420_v0 = vpack.c.bf16 %v356_v58, %v355_v57 }
  0xf1   : > { %v696_v6 = vadd.f32 %v3109_v41, %v695_v4  ;;  %v2610_v7 = vpop.f32.mrb[6].mxu0  ;;  %2733 = vmatprep.mubr.msk.bf16.mxu1 %vm1397_vm1, %v1318_v2 }
  0xf2   : > { %v707_v9 = vadd.f32 %v2610_v7, %v3109_v41  ;;  %v698_v10 = vpop.f32.mrb[7].mxu0  ;;  %2734 = vmatmul.mubr.msk.bf16.vlgmr.msra.gmra.mrb[0].mxu1 %vm1397_vm1, %v1319_v62  ;;  %v1196_v12 = vmax.f32 %v704_v3, 0.0 }
  0xf3   : > { %v699_v11 = vadd.f32 %v3109_v41, %v698_v10  ;;  %v1194_v14 = vmax.f32 %v696_v6, 0.0 }
  0xf4   : > { %v1197_v13 = vmax.f32 %v707_v9, 0.0  ;;  %2716 = vmatmul.mubr.msk.bf16.gmra.mrb[112].mxu0 %vm452_vm0, %v414_v5 }
  0xf5   : > { %v1195_v15 = vmax.f32 %v699_v11, 0.0  ;;  %2719 = vmatprep.mubr.msk.bf16.mxu0 %vm452_vm0, %v415_v8 }
  0xf6   : > { %v1321_v18 = vpack.c.bf16 %v1197_v13, %v1196_v12 }
  0xf7   : > { %v1320_v21 = vpack.c.bf16 %v1195_v15, %v1194_v14  ;;  %v2613_v22 = vpop.f32.mrb[8].mxu0 }
  0xf8   : > { %v720_v23 = vadd.f32 %v2613_v22, %v3109_v41  ;;  %v711_v24 = vpop.f32.mrb[9].mxu0 }
  0xf9   : > { %v712_v26 = vadd.f32 %v3109_v41, %v711_v24  ;;  %v2614_v27 = vpop.f32.mrb[10].mxu0  ;;  %2737 = vmatprep.mubr.msk.bf16.mxu1 %vm1397_vm1, %v1320_v21 }
  0xfa   : > { %v723_v29 = vadd.f32 %v2614_v27, %v3109_v41  ;;  %v714_v30 = vpop.f32.mrb[11].mxu0  ;;  %2738 = vmatmul.mubr.msk.bf16.gmra.mrb[4].mxu1 %vm1397_vm1, %v1321_v18  ;;  %v1200_v32 = vmax.f32 %v720_v23, 0.0 }
  0xfb   : > { %v715_v31 = vadd.f32 %v3109_v41, %v714_v30  ;;  %v1198_v34 = vmax.f32 %v712_v26, 0.0 }
  0xfc   : > { %v1201_v33 = vmax.f32 %v723_v29, 0.0  ;;  %2720 = vmatmul.mubr.msk.bf16.gmra.mrb[116].mxu0 %vm452_vm0, %v416_v25 }
  0xfd   : > { %v1199_v35 = vmax.f32 %v715_v31, 0.0  ;;  %2723 = vmatprep.mubr.msk.bf16.mxu0 %vm452_vm0, %v417_v28 }
  0xfe   : > { %v1323_v38 = vpack.c.bf16 %v1201_v33, %v1200_v32 }
  0xff   : > { %v1322_v42 = vpack.c.bf16 %v1199_v35, %v1198_v34  ;;  %v2617_v43 = vpop.f32.mrb[12].mxu0 }
 0x100   : > { %v736_v44 = vadd.f32 %v2617_v43, %v3109_v41  ;;  %v727_v45 = vpop.f32.mrb[13].mxu0 }
 0x101   : > { %v728_v47 = vadd.f32 %v3109_v41, %v727_v45  ;;  %v2618_v48 = vpop.f32.mrb[14].mxu0  ;;  %2741 = vmatprep.mubr.msk.bf16.mxu1 %vm1397_vm1, %v1322_v42 }
 0x102   : > { %v739_v50 = vadd.f32 %v2618_v48, %v3109_v41  ;;  %v730_v51 = vpop.f32.mrb[15].mxu0  ;;  %2742 = vmatmul.mubr.msk.bf16.gmra.mrb[8].mxu1 %vm1397_vm1, %v1323_v38  ;;  %v1204_v53 = vmax.f32 %v736_v44, 0.0 }
 0x103   : > { %v731_v52 = vadd.f32 %v3109_v41, %v730_v51  ;;  %v1202_v55 = vmax.f32 %v728_v47, 0.0 }
 0x104   : > { %v1205_v54 = vmax.f32 %v739_v50, 0.0  ;;  %2724 = vmatmul.mubr.msk.bf16.gmra.mrb[120].mxu0 %vm452_vm0, %v418_v46 }
 0x105   : > { %v1203_v56 = vmax.f32 %v731_v52, 0.0  ;;  %2727 = vmatprep.mubr.msk.bf16.mxu0 %vm452_vm0, %v419_v49 }
 0x106   : > { %v1325_v59 = vpack.c.bf16 %v1205_v54, %v1204_v53 }
 0x107   : > { %v1324_v60 = vpack.c.bf16 %v1203_v56, %v1202_v55  ;;  %v2621_v61 = vpop.f32.mrb[16].mxu0 }
 0x108   : > { %v752_v62 = vadd.f32 %v2621_v61, %v3109_v41  ;;  %v743_v63 = vpop.f32.mrb[17].mxu0 }
 0x109   : > { %v744_v1 = vadd.f32 %v3109_v41, %v743_v63  ;;  %v2622_v2 = vpop.f32.mrb[18].mxu0  ;;  %2745 = vmatprep.mubr.msk.bf16.mxu1 %vm1397_vm1, %v1324_v60 }
 0x10a   : > { %v755_v3 = vadd.f32 %v2622_v2, %v3109_v41  ;;  %v746_v4 = vpop.f32.mrb[19].mxu0  ;;  %2746 = vmatmul.mubr.msk.bf16.gmra.mrb[12].mxu1 %vm1397_vm1, %v1325_v59  ;;  %v1208_v6 = vmax.f32 %v752_v62, 0.0 }
 0x10b   : > { %v747_v5 = vadd.f32 %v3109_v41, %v746_v4  ;;  %v1206_v8 = vmax.f32 %v744_v1, 0.0 }
 0x10c   : > { %v1209_v7 = vmax.f32 %v755_v3, 0.0  ;;  %2728 = vmatmul.mubr.msk.bf16.gmra.mrb[124].mxu0 %vm452_vm0, %v420_v0 }
 0x10d   : > { %v1207_v9 = vmax.f32 %v747_v5, 0.0 }
 0x10e   : > { %v1327_v10 = vpack.c.bf16 %v1209_v7, %v1208_v6 }
 0x10f   : > { %v1326_v11 = vpack.c.bf16 %v1207_v9, %v1206_v8  ;;  %v2625_v12 = vpop.f32.mrb[20].mxu0 }
 0x110   : > { %v768_v13 = vadd.f32 %v2625_v12, %v3109_v41  ;;  %v759_v14 = vpop.f32.mrb[21].mxu0 }
 0x111   : > { %v760_v15 = vadd.f32 %v3109_v41, %v759_v14  ;;  %v2626_v16 = vpop.f32.mrb[22].mxu0  ;;  %2749 = vmatprep.mubr.msk.bf16.mxu1 %vm1397_vm1, %v1326_v11 }
 0x112   : > { %v771_v17 = vadd.f32 %v2626_v16, %v3109_v41  ;;  %v762_v18 = vpop.f32.mrb[23].mxu0  ;;  %2750 = vmatmul.mubr.msk.bf16.gmra.mrb[16].mxu1 %vm1397_vm1, %v1327_v10  ;;  %v1212_v20 = vmax.f32 %v768_v13, 0.0 }
 0x113   : > { %v763_v19 = vadd.f32 %v3109_v41, %v762_v18  ;;  %v1210_v22 = vmax.f32 %v760_v15, 0.0 }
 0x114   : > { %v1213_v21 = vmax.f32 %v771_v17, 0.0 }
 0x115   : > { %v1211_v23 = vmax.f32 %v763_v19, 0.0 }
 0x116   : > { %v1329_v24 = vpack.c.bf16 %v1213_v21, %v1212_v20 }
 0x117   : > { %v1328_v25 = vpack.c.bf16 %v1211_v23, %v1210_v22  ;;  %v2629_v26 = vpop.f32.mrb[24].mxu0 }
 0x118   : > { %v784_v27 = vadd.f32 %v2629_v26, %v3109_v41  ;;  %v775_v28 = vpop.f32.mrb[25].mxu0 }
 0x119   : > { %v776_v29 = vadd.f32 %v3109_v41, %v775_v28  ;;  %v2630_v30 = vpop.f32.mrb[26].mxu0  ;;  %2753 = vmatprep.mubr.msk.bf16.mxu1 %vm1397_vm1, %v1328_v25 }
 0x11a   : > { %v787_v31 = vadd.f32 %v2630_v30, %v3109_v41  ;;  %v778_v32 = vpop.f32.mrb[27].mxu0  ;;  %2754 = vmatmul.mubr.msk.bf16.gmra.mrb[20].mxu1 %vm1397_vm1, %v1329_v24  ;;  %v1216_v34 = vmax.f32 %v784_v27, 0.0 }
 0x11b   : > { %v779_v33 = vadd.f32 %v3109_v41, %v778_v32  ;;  %v1214_v36 = vmax.f32 %v776_v29, 0.0 }
 0x11c   : > { %v1217_v35 = vmax.f32 %v787_v31, 0.0 }
 0x11d   : > { %v1215_v37 = vmax.f32 %v779_v33, 0.0 }
 0x11e   : > { %v1331_v38 = vpack.c.bf16 %v1217_v35, %v1216_v34 }
 0x11f   : > { %v1330_v39 = vpack.c.bf16 %v1215_v37, %v1214_v36  ;;  %v2633_v40 = vpop.f32.mrb[28].mxu0 }
 0x120   : > { %v800_v42 = vadd.f32 %v2633_v40, %v3109_v41  ;;  %v791_v43 = vpop.f32.mrb[29].mxu0 }
 0x121   : > { %v792_v44 = vadd.f32 %v3109_v41, %v791_v43  ;;  %v2634_v45 = vpop.f32.mrb[30].mxu0  ;;  %2757 = vmatprep.mubr.msk.bf16.mxu1 %vm1397_vm1, %v1330_v39 }
 0x122   : > { %v803_v46 = vadd.f32 %v2634_v45, %v3109_v41  ;;  %v794_v47 = vpop.f32.mrb[31].mxu0  ;;  %2758 = vmatmul.mubr.msk.bf16.gmra.mrb[24].mxu1 %vm1397_vm1, %v1331_v38  ;;  %v1220_v49 = vmax.f32 %v800_v42, 0.0 }
 0x123   : > { %v795_v48 = vadd.f32 %v3109_v41, %v794_v47  ;;  %v1218_v51 = vmax.f32 %v792_v44, 0.0 }
 0x124   : > { %v1221_v50 = vmax.f32 %v803_v46, 0.0 }
 0x125   : > { %v1219_v52 = vmax.f32 %v795_v48, 0.0 }
 0x126   : > { %v1333_v53 = vpack.c.bf16 %v1221_v50, %v1220_v49 }
 0x127   : > { %v1332_v54 = vpack.c.bf16 %v1219_v52, %v1218_v51  ;;  %v2637_v55 = vpop.f32.mrb[32].mxu0 }
 0x128   : > { %v816_v56 = vadd.f32 %v2637_v55, %v3109_v41  ;;  %v807_v57 = vpop.f32.mrb[33].mxu0 }
 0x129   : > { %v808_v58 = vadd.f32 %v3109_v41, %v807_v57  ;;  %v2638_v59 = vpop.f32.mrb[34].mxu0  ;;  %2761 = vmatprep.mubr.msk.bf16.mxu1 %vm1397_vm1, %v1332_v54 }
 0x12a   : > { %v819_v60 = vadd.f32 %v2638_v59, %v3109_v41  ;;  %v810_v61 = vpop.f32.mrb[35].mxu0  ;;  %2762 = vmatmul.mubr.msk.bf16.gmra.mrb[28].mxu1 %vm1397_vm1, %v1333_v53  ;;  %v1224_v63 = vmax.f32 %v816_v56, 0.0 }
 0x12b   : > { %v811_v62 = vadd.f32 %v3109_v41, %v810_v61  ;;  %v1222_v1 = vmax.f32 %v808_v58, 0.0 }
 0x12c   : > { %v1225_v0 = vmax.f32 %v819_v60, 0.0 }
 0x12d   : > { %v1223_v2 = vmax.f32 %v811_v62, 0.0 }
 0x12e   : > { %v1335_v3 = vpack.c.bf16 %v1225_v0, %v1224_v63 }
 0x12f   : > { %v1334_v4 = vpack.c.bf16 %v1223_v2, %v1222_v1  ;;  %v2641_v5 = vpop.f32.mrb[36].mxu0 }
 0x130   : > { %v832_v6 = vadd.f32 %v2641_v5, %v3109_v41  ;;  %v823_v7 = vpop.f32.mrb[37].mxu0 }
 0x131   : > { %v824_v8 = vadd.f32 %v3109_v41, %v823_v7  ;;  %v2642_v9 = vpop.f32.mrb[38].mxu0  ;;  %2765 = vmatprep.mubr.msk.bf16.mxu1 %vm1397_vm1, %v1334_v4 }
 0x132   : > { %v835_v10 = vadd.f32 %v2642_v9, %v3109_v41  ;;  %v826_v11 = vpop.f32.mrb[39].mxu0  ;;  %2766 = vmatmul.mubr.msk.bf16.gmra.mrb[32].mxu1 %vm1397_vm1, %v1335_v3  ;;  %v1228_v13 = vmax.f32 %v832_v6, 0.0 }
 0x133   : > { %v827_v12 = vadd.f32 %v3109_v41, %v826_v11  ;;  %v1226_v15 = vmax.f32 %v824_v8, 0.0 }
 0x134   : > { %v1229_v14 = vmax.f32 %v835_v10, 0.0 }
 0x135   : > { %v1227_v16 = vmax.f32 %v827_v12, 0.0 }
 0x136   : > { %v1337_v17 = vpack.c.bf16 %v1229_v14, %v1228_v13 }
 0x137   : > { %v1336_v18 = vpack.c.bf16 %v1227_v16, %v1226_v15  ;;  %v2645_v19 = vpop.f32.mrb[40].mxu0 }
 0x138   : > { %v848_v20 = vadd.f32 %v2645_v19, %v3109_v41  ;;  %v839_v21 = vpop.f32.mrb[41].mxu0 }
 0x139   : > { %v840_v22 = vadd.f32 %v3109_v41, %v839_v21  ;;  %v2646_v23 = vpop.f32.mrb[42].mxu0  ;;  %2769 = vmatprep.mubr.msk.bf16.mxu1 %vm1397_vm1, %v1336_v18 }
 0x13a   : > { %v851_v24 = vadd.f32 %v2646_v23, %v3109_v41  ;;  %v842_v25 = vpop.f32.mrb[43].mxu0  ;;  %2770 = vmatmul.mubr.msk.bf16.gmra.mrb[36].mxu1 %vm1397_vm1, %v1337_v17  ;;  %v1232_v27 = vmax.f32 %v848_v20, 0.0 }
 0x13b   : > { %v843_v26 = vadd.f32 %v3109_v41, %v842_v25  ;;  %v1230_v29 = vmax.f32 %v840_v22, 0.0 }
 0x13c   : > { %v1233_v28 = vmax.f32 %v851_v24, 0.0 }
 0x13d   : > { %v1231_v30 = vmax.f32 %v843_v26, 0.0 }
 0x13e   : > { %v1339_v31 = vpack.c.bf16 %v1233_v28, %v1232_v27 }
 0x13f   : > { %v1338_v32 = vpack.c.bf16 %v1231_v30, %v1230_v29  ;;  %v2649_v33 = vpop.f32.mrb[44].mxu0 }
 0x140   : > { %v864_v34 = vadd.f32 %v2649_v33, %v3109_v41  ;;  %v855_v35 = vpop.f32.mrb[45].mxu0 }
 0x141   : > { %v856_v36 = vadd.f32 %v3109_v41, %v855_v35  ;;  %v2650_v37 = vpop.f32.mrb[46].mxu0  ;;  %2773 = vmatprep.mubr.msk.bf16.mxu1 %vm1397_vm1, %v1338_v32 }
 0x142   : > { %v867_v38 = vadd.f32 %v2650_v37, %v3109_v41  ;;  %v858_v39 = vpop.f32.mrb[47].mxu0  ;;  %2774 = vmatmul.mubr.msk.bf16.gmra.mrb[40].mxu1 %vm1397_vm1, %v1339_v31  ;;  %v1236_v42 = vmax.f32 %v864_v34, 0.0 }
 0x143   : > { %v859_v40 = vadd.f32 %v3109_v41, %v858_v39  ;;  %v1234_v44 = vmax.f32 %v856_v36, 0.0 }
 0x144   : > { %v1237_v43 = vmax.f32 %v867_v38, 0.0 }
 0x145   : > { %v1235_v45 = vmax.f32 %v859_v40, 0.0 }
 0x146   : > { %v1341_v46 = vpack.c.bf16 %v1237_v43, %v1236_v42 }
 0x147   : > { %v1340_v47 = vpack.c.bf16 %v1235_v45, %v1234_v44  ;;  %v2653_v48 = vpop.f32.mrb[48].mxu0 }
 0x148   : > { %v880_v49 = vadd.f32 %v2653_v48, %v3109_v41  ;;  %v871_v50 = vpop.f32.mrb[49].mxu0 }
 0x149   : > { %v872_v51 = vadd.f32 %v3109_v41, %v871_v50  ;;  %v2654_v52 = vpop.f32.mrb[50].mxu0  ;;  %2777 = vmatprep.mubr.msk.bf16.mxu1 %vm1397_vm1, %v1340_v47 }
 0x14a   : > { %v883_v53 = vadd.f32 %v2654_v52, %v3109_v41  ;;  %v874_v54 = vpop.f32.mrb[51].mxu0  ;;  %2778 = vmatmul.mubr.msk.bf16.gmra.mrb[44].mxu1 %vm1397_vm1, %v1341_v46  ;;  %v1240_v56 = vmax.f32 %v880_v49, 0.0 }
 0x14b   : > { %v875_v55 = vadd.f32 %v3109_v41, %v874_v54  ;;  %v1238_v58 = vmax.f32 %v872_v51, 0.0 }
 0x14c   : > { %v1241_v57 = vmax.f32 %v883_v53, 0.0 }
 0x14d   : > { %v1239_v59 = vmax.f32 %v875_v55, 0.0 }
 0x14e   : > { %v1343_v60 = vpack.c.bf16 %v1241_v57, %v1240_v56 }
 0x14f   : > { %v1342_v61 = vpack.c.bf16 %v1239_v59, %v1238_v58  ;;  %v2657_v62 = vpop.f32.mrb[52].mxu0 }
 0x150   : > { %v896_v63 = vadd.f32 %v2657_v62, %v3109_v41  ;;  %v887_v0 = vpop.f32.mrb[53].mxu0 }
 0x151   : > { %v888_v1 = vadd.f32 %v3109_v41, %v887_v0  ;;  %v2658_v2 = vpop.f32.mrb[54].mxu0  ;;  %2781 = vmatprep.mubr.msk.bf16.mxu1 %vm1397_vm1, %v1342_v61 }
 0x152   : > { %v899_v3 = vadd.f32 %v2658_v2, %v3109_v41  ;;  %v890_v4 = vpop.f32.mrb[55].mxu0  ;;  %2782 = vmatmul.mubr.msk.bf16.gmra.mrb[48].mxu1 %vm1397_vm1, %v1343_v60  ;;  %v1244_v6 = vmax.f32 %v896_v63, 0.0 }
 0x153   : > { %v891_v5 = vadd.f32 %v3109_v41, %v890_v4  ;;  %v1242_v8 = vmax.f32 %v888_v1, 0.0 }
 0x154   : > { %v1245_v7 = vmax.f32 %v899_v3, 0.0 }
 0x155   : > { %v1243_v9 = vmax.f32 %v891_v5, 0.0 }
 0x156   : > { %v1345_v10 = vpack.c.bf16 %v1245_v7, %v1244_v6 }
 0x157   : > { %v1344_v11 = vpack.c.bf16 %v1243_v9, %v1242_v8  ;;  %v2661_v12 = vpop.f32.mrb[56].mxu0 }
 0x158   : > { %v912_v13 = vadd.f32 %v2661_v12, %v3109_v41  ;;  %v903_v14 = vpop.f32.mrb[57].mxu0 }
 0x159   : > { %v904_v15 = vadd.f32 %v3109_v41, %v903_v14  ;;  %v2662_v16 = vpop.f32.mrb[58].mxu0  ;;  %2785 = vmatprep.mubr.msk.bf16.mxu1 %vm1397_vm1, %v1344_v11 }
 0x15a   : > { %v915_v17 = vadd.f32 %v2662_v16, %v3109_v41  ;;  %v906_v18 = vpop.f32.mrb[59].mxu0  ;;  %2786 = vmatmul.mubr.msk.bf16.gmra.mrb[52].mxu1 %vm1397_vm1, %v1345_v10  ;;  %v1248_v20 = vmax.f32 %v912_v13, 0.0 }
 0x15b   : > { %v907_v19 = vadd.f32 %v3109_v41, %v906_v18  ;;  %v1246_v22 = vmax.f32 %v904_v15, 0.0 }
 0x15c   : > { %v1249_v21 = vmax.f32 %v915_v17, 0.0 }
 0x15d   : > { %v1247_v23 = vmax.f32 %v907_v19, 0.0 }
 0x15e   : > { %v1347_v24 = vpack.c.bf16 %v1249_v21, %v1248_v20 }
 0x15f   : > { %v1346_v25 = vpack.c.bf16 %v1247_v23, %v1246_v22  ;;  %v2665_v26 = vpop.f32.mrb[60].mxu0 }
 0x160   : > { %v928_v27 = vadd.f32 %v2665_v26, %v3109_v41  ;;  %v919_v28 = vpop.f32.mrb[61].mxu0 }
 0x161   : > { %v920_v29 = vadd.f32 %v3109_v41, %v919_v28  ;;  %v2666_v30 = vpop.f32.mrb[62].mxu0  ;;  %2789 = vmatprep.mubr.msk.bf16.mxu1 %vm1397_vm1, %v1346_v25 }
 0x162   : > { %v931_v31 = vadd.f32 %v2666_v30, %v3109_v41  ;;  %v922_v32 = vpop.f32.mrb[63].mxu0  ;;  %2790 = vmatmul.mubr.msk.bf16.gmra.mrb[56].mxu1 %vm1397_vm1, %v1347_v24  ;;  %v1252_v34 = vmax.f32 %v928_v27, 0.0 }
 0x163   : > { %v923_v33 = vadd.f32 %v3109_v41, %v922_v32  ;;  %v1250_v36 = vmax.f32 %v920_v29, 0.0 }
 0x164   : > { %v1253_v35 = vmax.f32 %v931_v31, 0.0 }
 0x165   : > { %v1251_v37 = vmax.f32 %v923_v33, 0.0 }
 0x166   : > { %v1349_v38 = vpack.c.bf16 %v1253_v35, %v1252_v34 }
 0x167   : > { %v1348_v39 = vpack.c.bf16 %v1251_v37, %v1250_v36  ;;  %v2669_v40 = vpop.f32.mrb[64].mxu0 }
 0x168   : > { %v944_v42 = vadd.f32 %v2669_v40, %v3109_v41  ;;  %v935_v43 = vpop.f32.mrb[65].mxu0 }
 0x169   : > { %v936_v44 = vadd.f32 %v3109_v41, %v935_v43  ;;  %v2670_v45 = vpop.f32.mrb[66].mxu0  ;;  %2793 = vmatprep.mubr.msk.bf16.mxu1 %vm1397_vm1, %v1348_v39 }
 0x16a   : > { %v947_v46 = vadd.f32 %v2670_v45, %v3109_v41  ;;  %v938_v47 = vpop.f32.mrb[67].mxu0  ;;  %2794 = vmatmul.mubr.msk.bf16.gmra.mrb[60].mxu1 %vm1397_vm1, %v1349_v38  ;;  %v1256_v49 = vmax.f32 %v944_v42, 0.0 }
 0x16b   : > { %v939_v48 = vadd.f32 %v3109_v41, %v938_v47  ;;  %v1254_v51 = vmax.f32 %v936_v44, 0.0 }
 0x16c   : > { %v1257_v50 = vmax.f32 %v947_v46, 0.0 }
 0x16d   : > { %v1255_v52 = vmax.f32 %v939_v48, 0.0 }
 0x16e   : > { %v1351_v53 = vpack.c.bf16 %v1257_v50, %v1256_v49 }
 0x16f   : > { %v1350_v54 = vpack.c.bf16 %v1255_v52, %v1254_v51  ;;  %v2673_v55 = vpop.f32.mrb[68].mxu0 }
 0x170   : > { %v960_v56 = vadd.f32 %v2673_v55, %v3109_v41  ;;  %v951_v57 = vpop.f32.mrb[69].mxu0 }
 0x171   : > { %v952_v58 = vadd.f32 %v3109_v41, %v951_v57  ;;  %v2674_v59 = vpop.f32.mrb[70].mxu0  ;;  %2797 = vmatprep.mubr.msk.bf16.mxu1 %vm1397_vm1, %v1350_v54 }
 0x172   : > { %v963_v60 = vadd.f32 %v2674_v59, %v3109_v41  ;;  %v954_v61 = vpop.f32.mrb[71].mxu0  ;;  %2798 = vmatmul.mubr.msk.bf16.gmra.mrb[64].mxu1 %vm1397_vm1, %v1351_v53  ;;  %v1260_v63 = vmax.f32 %v960_v56, 0.0 }
 0x173   : > { %v955_v62 = vadd.f32 %v3109_v41, %v954_v61  ;;  %v1258_v1 = vmax.f32 %v952_v58, 0.0 }
 0x174   : > { %v1261_v0 = vmax.f32 %v963_v60, 0.0 }
 0x175   : > { %v1259_v2 = vmax.f32 %v955_v62, 0.0 }
 0x176   : > { %v1353_v3 = vpack.c.bf16 %v1261_v0, %v1260_v63 }
 0x177   : > { %v1352_v4 = vpack.c.bf16 %v1259_v2, %v1258_v1  ;;  %v2677_v5 = vpop.f32.mrb[72].mxu0 }
 0x178   : > { %v976_v6 = vadd.f32 %v2677_v5, %v3109_v41  ;;  %v967_v7 = vpop.f32.mrb[73].mxu0 }
 0x179   : > { %v968_v8 = vadd.f32 %v3109_v41, %v967_v7  ;;  %v2678_v9 = vpop.f32.mrb[74].mxu0  ;;  %2801 = vmatprep.mubr.msk.bf16.mxu1 %vm1397_vm1, %v1352_v4 }
 0x17a   : > { %v979_v10 = vadd.f32 %v2678_v9, %v3109_v41  ;;  %v970_v11 = vpop.f32.mrb[75].mxu0  ;;  %2802 = vmatmul.mubr.msk.bf16.gmra.mrb[68].mxu1 %vm1397_vm1, %v1353_v3  ;;  %v1264_v13 = vmax.f32 %v976_v6, 0.0 }
 0x17b   : > { %v971_v12 = vadd.f32 %v3109_v41, %v970_v11  ;;  %v1262_v15 = vmax.f32 %v968_v8, 0.0 }
 0x17c   : > { %v1265_v14 = vmax.f32 %v979_v10, 0.0 }
 0x17d   : > { %v1263_v16 = vmax.f32 %v971_v12, 0.0 }
 0x17e   : > { %v1355_v17 = vpack.c.bf16 %v1265_v14, %v1264_v13 }
 0x17f   : > { %v1354_v18 = vpack.c.bf16 %v1263_v16, %v1262_v15  ;;  %v2681_v19 = vpop.f32.mrb[76].mxu0 }
 0x180   : > { %v992_v20 = vadd.f32 %v2681_v19, %v3109_v41  ;;  %v983_v21 = vpop.f32.mrb[77].mxu0 }
 0x181   : > { %v984_v22 = vadd.f32 %v3109_v41, %v983_v21  ;;  %v2682_v23 = vpop.f32.mrb[78].mxu0  ;;  %2805 = vmatprep.mubr.msk.bf16.mxu1 %vm1397_vm1, %v1354_v18 }
 0x182   : > { %v995_v24 = vadd.f32 %v2682_v23, %v3109_v41  ;;  %v986_v25 = vpop.f32.mrb[79].mxu0  ;;  %2806 = vmatmul.mubr.msk.bf16.gmra.mrb[72].mxu1 %vm1397_vm1, %v1355_v17  ;;  %v1268_v27 = vmax.f32 %v992_v20, 0.0 }
 0x183   : > { %v987_v26 = vadd.f32 %v3109_v41, %v986_v25  ;;  %v1266_v29 = vmax.f32 %v984_v22, 0.0 }
 0x184   : > { %v1269_v28 = vmax.f32 %v995_v24, 0.0 }
 0x185   : > { %v1267_v30 = vmax.f32 %v987_v26, 0.0 }
 0x186   : > { %v1357_v31 = vpack.c.bf16 %v1269_v28, %v1268_v27 }
 0x187   : > { %v1356_v32 = vpack.c.bf16 %v1267_v30, %v1266_v29  ;;  %v2685_v33 = vpop.f32.mrb[80].mxu0 }
 0x188   : > { %v1008_v34 = vadd.f32 %v2685_v33, %v3109_v41  ;;  %v999_v35 = vpop.f32.mrb[81].mxu0 }
 0x189   : > { %v1000_v36 = vadd.f32 %v3109_v41, %v999_v35  ;;  %v2686_v37 = vpop.f32.mrb[82].mxu0  ;;  %2809 = vmatprep.mubr.msk.bf16.mxu1 %vm1397_vm1, %v1356_v32 }
 0x18a   : > { %v1011_v38 = vadd.f32 %v2686_v37, %v3109_v41  ;;  %v1002_v39 = vpop.f32.mrb[83].mxu0  ;;  %2810 = vmatmul.mubr.msk.bf16.gmra.mrb[76].mxu1 %vm1397_vm1, %v1357_v31  ;;  %v1272_v42 = vmax.f32 %v1008_v34, 0.0 }
 0x18b   : > { %v1003_v40 = vadd.f32 %v3109_v41, %v1002_v39  ;;  %v1270_v44 = vmax.f32 %v1000_v36, 0.0 }
 0x18c   : > { %v1273_v43 = vmax.f32 %v1011_v38, 0.0 }
 0x18d   : > { %v1271_v45 = vmax.f32 %v1003_v40, 0.0 }
 0x18e   : > { %v1359_v46 = vpack.c.bf16 %v1273_v43, %v1272_v42 }
 0x18f   : > { %v1358_v47 = vpack.c.bf16 %v1271_v45, %v1270_v44  ;;  %v2689_v48 = vpop.f32.mrb[84].mxu0 }
 0x190   : > { %v1024_v49 = vadd.f32 %v2689_v48, %v3109_v41  ;;  %v1015_v50 = vpop.f32.mrb[85].mxu0 }
 0x191   : > { %v1016_v51 = vadd.f32 %v3109_v41, %v1015_v50  ;;  %v2690_v52 = vpop.f32.mrb[86].mxu0  ;;  %2813 = vmatprep.mubr.msk.bf16.mxu1 %vm1397_vm1, %v1358_v47 }
 0x192   : > { %v1027_v53 = vadd.f32 %v2690_v52, %v3109_v41  ;;  %v1018_v54 = vpop.f32.mrb[87].mxu0  ;;  %2814 = vmatmul.mubr.msk.bf16.gmra.mrb[80].mxu1 %vm1397_vm1, %v1359_v46  ;;  %v1276_v56 = vmax.f32 %v1024_v49, 0.0 }
 0x193   : > { %v1019_v55 = vadd.f32 %v3109_v41, %v1018_v54  ;;  %v1274_v58 = vmax.f32 %v1016_v51, 0.0 }
 0x194   : > { %v1277_v57 = vmax.f32 %v1027_v53, 0.0 }
 0x195   : > { %v1275_v59 = vmax.f32 %v1019_v55, 0.0 }
 0x196   : > { %v1361_v60 = vpack.c.bf16 %v1277_v57, %v1276_v56 }
 0x197   : > { %v1360_v61 = vpack.c.bf16 %v1275_v59, %v1274_v58  ;;  %v2693_v62 = vpop.f32.mrb[88].mxu0 }
 0x198   : > { %v1040_v63 = vadd.f32 %v2693_v62, %v3109_v41  ;;  %v1031_v0 = vpop.f32.mrb[89].mxu0 }
 0x199   : > { %v1032_v1 = vadd.f32 %v3109_v41, %v1031_v0  ;;  %v2694_v2 = vpop.f32.mrb[90].mxu0  ;;  %2817 = vmatprep.mubr.msk.bf16.mxu1 %vm1397_vm1, %v1360_v61 }
 0x19a   : > { %v1043_v3 = vadd.f32 %v2694_v2, %v3109_v41  ;;  %v1034_v4 = vpop.f32.mrb[91].mxu0  ;;  %2818 = vmatmul.mubr.msk.bf16.gmra.mrb[84].mxu1 %vm1397_vm1, %v1361_v60  ;;  %v1280_v6 = vmax.f32 %v1040_v63, 0.0 }
 0x19b   : > { %v1035_v5 = vadd.f32 %v3109_v41, %v1034_v4  ;;  %v1278_v8 = vmax.f32 %v1032_v1, 0.0 }
 0x19c   : > { %v1281_v7 = vmax.f32 %v1043_v3, 0.0 }
 0x19d   : > { %v1279_v9 = vmax.f32 %v1035_v5, 0.0 }
 0x19e   : > { %v1363_v10 = vpack.c.bf16 %v1281_v7, %v1280_v6 }
 0x19f   : > { %v1362_v11 = vpack.c.bf16 %v1279_v9, %v1278_v8  ;;  %v2697_v12 = vpop.f32.mrb[92].mxu0 }
 0x1a0   : > { %v1056_v13 = vadd.f32 %v2697_v12, %v3109_v41  ;;  %v1047_v14 = vpop.f32.mrb[93].mxu0 }
 0x1a1   : > { %v1048_v15 = vadd.f32 %v3109_v41, %v1047_v14  ;;  %v2698_v16 = vpop.f32.mrb[94].mxu0  ;;  %2821 = vmatprep.mubr.msk.bf16.mxu1 %vm1397_vm1, %v1362_v11 }
 0x1a2   : > { %v1059_v17 = vadd.f32 %v2698_v16, %v3109_v41  ;;  %v1050_v18 = vpop.f32.mrb[95].mxu0  ;;  %2822 = vmatmul.mubr.msk.bf16.gmra.mrb[88].mxu1 %vm1397_vm1, %v1363_v10  ;;  %v1284_v20 = vmax.f32 %v1056_v13, 0.0  ;;  %v3308_v13 = vld [vmem:[%s3739_s4] ss:$0 sm:$0xff] }
 0x1a3   : > { %v1051_v19 = vadd.f32 %v3109_v41, %v1050_v18  ;;  %v1282_v22 = vmax.f32 %v1048_v15, 0.0 }
 0x1a4   : > { %v1285_v21 = vmax.f32 %v1059_v17, 0.0 }
 0x1a5   : > { %v1283_v23 = vmax.f32 %v1051_v19, 0.0 }
 0x1a6   : > { %v1365_v24 = vpack.c.bf16 %v1285_v21, %v1284_v20 }
 0x1a7   : > { %v1364_v25 = vpack.c.bf16 %v1283_v23, %v1282_v22  ;;  %v2701_v26 = vpop.f32.mrb[96].mxu0 }
 0x1a8   : > { %v1072_v27 = vadd.f32 %v2701_v26, %v3109_v41  ;;  %v1063_v28 = vpop.f32.mrb[97].mxu0 }
 0x1a9   : > { %v1064_v29 = vadd.f32 %v3109_v41, %v1063_v28  ;;  %v2702_v30 = vpop.f32.mrb[98].mxu0  ;;  %2825 = vmatprep.mubr.msk.bf16.mxu1 %vm1397_vm1, %v1364_v25 }
 0x1aa   : > { %v1075_v31 = vadd.f32 %v2702_v30, %v3109_v41  ;;  %v1066_v32 = vpop.f32.mrb[99].mxu0  ;;  %2826 = vmatmul.mubr.msk.bf16.gmra.mrb[92].mxu1 %vm1397_vm1, %v1365_v24  ;;  %v1288_v34 = vmax.f32 %v1072_v27, 0.0 }
 0x1ab   : > { %v1067_v33 = vadd.f32 %v3109_v41, %v1066_v32  ;;  %v1286_v36 = vmax.f32 %v1064_v29, 0.0 }
 0x1ac   : > { %v1289_v35 = vmax.f32 %v1075_v31, 0.0 }
 0x1ad   : > { %v1287_v37 = vmax.f32 %v1067_v33, 0.0 }
 0x1ae   : > { %v1367_v38 = vpack.c.bf16 %v1289_v35, %v1288_v34 }
 0x1af   : > { %v1366_v39 = vpack.c.bf16 %v1287_v37, %v1286_v36  ;;  %v2705_v40 = vpop.f32.mrb[100].mxu0 }
 0x1b0   : > { %v1088_v42 = vadd.f32 %v2705_v40, %v3109_v41  ;;  %v1079_v43 = vpop.f32.mrb[101].mxu0 }
 0x1b1   : > { %v1080_v44 = vadd.f32 %v3109_v41, %v1079_v43  ;;  %v2706_v45 = vpop.f32.mrb[102].mxu0  ;;  %2829 = vmatprep.mubr.msk.bf16.mxu1 %vm1397_vm1, %v1366_v39 }
 0x1b2   : > { %v1091_v46 = vadd.f32 %v2706_v45, %v3109_v41  ;;  %v1082_v47 = vpop.f32.mrb[103].mxu0  ;;  %2830 = vmatmul.mubr.msk.bf16.gmra.mrb[96].mxu1 %vm1397_vm1, %v1367_v38  ;;  %v1292_v49 = vmax.f32 %v1088_v42, 0.0 }
 0x1b3   : > { %v1083_v48 = vadd.f32 %v3109_v41, %v1082_v47  ;;  %v1290_v51 = vmax.f32 %v1080_v44, 0.0 }
 0x1b4   : > { %v1293_v50 = vmax.f32 %v1091_v46, 0.0 }
 0x1b5   : > { %v1291_v52 = vmax.f32 %v1083_v48, 0.0 }
 0x1b6   : > { %v1369_v53 = vpack.c.bf16 %v1293_v50, %v1292_v49 }
 0x1b7   : > { %v1368_v54 = vpack.c.bf16 %v1291_v52, %v1290_v51  ;;  %v2709_v55 = vpop.f32.mrb[104].mxu0 }
 0x1b8   : > { %v1104_v56 = vadd.f32 %v2709_v55, %v3109_v41  ;;  %v1095_v57 = vpop.f32.mrb[105].mxu0 }
 0x1b9   : > { %v1096_v58 = vadd.f32 %v3109_v41, %v1095_v57  ;;  %v2710_v59 = vpop.f32.mrb[106].mxu0  ;;  %2833 = vmatprep.mubr.msk.bf16.mxu1 %vm1397_vm1, %v1368_v54 }
 0x1ba   : > { %v1107_v60 = vadd.f32 %v2710_v59, %v3109_v41  ;;  %v1098_v61 = vpop.f32.mrb[107].mxu0  ;;  %2834 = vmatmul.mubr.msk.bf16.gmra.mrb[100].mxu1 %vm1397_vm1, %v1369_v53  ;;  %v1296_v63 = vmax.f32 %v1104_v56, 0.0 }
 0x1bb   : > { %v1099_v62 = vadd.f32 %v3109_v41, %v1098_v61  ;;  %v1294_v1 = vmax.f32 %v1096_v58, 0.0 }
 0x1bc   : > { %v1297_v0 = vmax.f32 %v1107_v60, 0.0 }
 0x1bd   : > { %v1295_v2 = vmax.f32 %v1099_v62, 0.0 }
 0x1be   : > { %v1371_v3 = vpack.c.bf16 %v1297_v0, %v1296_v63 }
 0x1bf   : > { %v1370_v4 = vpack.c.bf16 %v1295_v2, %v1294_v1  ;;  %v2713_v5 = vpop.f32.mrb[108].mxu0 }
 0x1c0   : > { %v1120_v6 = vadd.f32 %v2713_v5, %v3109_v41  ;;  %v1111_v7 = vpop.f32.mrb[109].mxu0 }
 0x1c1   : > { %v1112_v8 = vadd.f32 %v3109_v41, %v1111_v7  ;;  %v2714_v9 = vpop.f32.mrb[110].mxu0  ;;  %2837 = vmatprep.mubr.msk.bf16.mxu1 %vm1397_vm1, %v1370_v4 }
 0x1c2   : > { %v1123_v10 = vadd.f32 %v2714_v9, %v3109_v41  ;;  %v1114_v11 = vpop.f32.mrb[111].mxu0  ;;  %2838 = vmatmul.mubr.msk.bf16.gmra.mrb[104].mxu1 %vm1397_vm1, %v1371_v3  ;;  %v1300_v14 = vmax.f32 %v1120_v6, 0.0 }
 0x1c3   : > { %v1115_v12 = vadd.f32 %v3109_v41, %v1114_v11  ;;  %v1298_v16 = vmax.f32 %v1112_v8, 0.0 }
 0x1c4   : > { %v1301_v15 = vmax.f32 %v1123_v10, 0.0 }
 0x1c5   : > { %v1299_v17 = vmax.f32 %v1115_v12, 0.0  ;;  %v2735_v18 = vpop.f32.mrb[0].mxu1 }
 0x1c6   : > { %v1373_v19 = vpack.c.bf16 %v1301_v15, %v1300_v14  ;;  %v1633_v20 = vadd.f32 %v2735_v18, %v3308_v13  ;;  %v1624_v21 = vpop.f32.mrb[1].mxu1 }
 0x1c7   : > { %v1372_v22 = vpack.c.bf16 %v1299_v17, %v1298_v16  ;;  %v1625_v23 = vadd.f32 %v3308_v13, %v1624_v21  ;;  %v2717_v24 = vpop.f32.mrb[112].mxu0  ;;  %v2736_v25 = vpop.f32.mrb[2].mxu1 }
 0x1c8   : > { %2138 = vst.msk [vmem:[%s3315_s14 + $0x10] sm:$0xff] %vm2135_vm2, %v1633_v20  ;;  %v1136_v26 = vadd.f32 %v2717_v24, %v3109_v41  ;;  %v1636_v27 = vadd.f32 %v2736_v25, %v3308_v13  ;;  %v1127_v28 = vpop.f32.mrb[113].mxu0  ;;  %v1627_v29 = vpop.f32.mrb[3].mxu1 }
 0x1c9   : > { %2136 = vst.msk [vmem:[%s3315_s14] sm:$0xff] %vm2135_vm2, %v1625_v23  ;;  %v1128_v30 = vadd.f32 %v3109_v41, %v1127_v28  ;;  %v1628_v31 = vadd.f32 %v3308_v13, %v1627_v29  ;;  %v2718_v32 = vpop.f32.mrb[114].mxu0  ;;  %2841 = vmatprep.mubr.msk.bf16.mxu1 %vm1397_vm1, %v1372_v22 }
 0x1ca   : > { %2139 = vst.msk [vmem:[%s3315_s14 + $0x18] sm:$0xff] %vm2135_vm2, %v1636_v27  ;;  %v1139_v33 = vadd.f32 %v2718_v32, %v3109_v41  ;;  %v1130_v34 = vpop.f32.mrb[115].mxu0  ;;  %2842 = vmatmul.mubr.msk.bf16.gmra.mrb[108].mxu1 %vm1397_vm1, %v1373_v19  ;;  %v1304_v36 = vmax.f32 %v1136_v26, 0.0 }
 0x1cb   : > { %2137 = vst.msk [vmem:[%s3315_s14 + $0x8] sm:$0xff] %vm2135_vm2, %v1628_v31  ;;  %v1131_v35 = vadd.f32 %v3109_v41, %v1130_v34  ;;  %v1302_v38 = vmax.f32 %v1128_v30, 0.0  ;;  %v3342_v41 = vld [vmem:[%s3737_s2] ss:$0 sm:$0xff] }
 0x1cc   : > { %v1305_v37 = vmax.f32 %v1139_v33, 0.0 }
 0x1cd   : > { %v1303_v39 = vmax.f32 %v1131_v35, 0.0  ;;  %v2739_v40 = vpop.f32.mrb[4].mxu1 }
 0x1ce   : > { %v1375_v42 = vpack.c.bf16 %v1305_v37, %v1304_v36  ;;  %v1649_v43 = vadd.f32 %v2739_v40, %v3308_v13  ;;  %v1640_v44 = vpop.f32.mrb[5].mxu1 }
 0x1cf   : > { %v1374_v45 = vpack.c.bf16 %v1303_v39, %v1302_v38  ;;  %v1641_v46 = vadd.f32 %v3308_v13, %v1640_v44  ;;  %v2721_v47 = vpop.f32.mrb[116].mxu0  ;;  %v2740_v48 = vpop.f32.mrb[6].mxu1 }
 0x1d0   : > { %2142 = vst.msk [vmem:[%s3315_s14 + $0x30] sm:$0xff] %vm2135_vm2, %v1649_v43  ;;  %v1152_v49 = vadd.f32 %v3342_v41, %v2721_v47  ;;  %v1652_v50 = vadd.f32 %v2740_v48, %v3308_v13  ;;  %v1143_v51 = vpop.f32.mrb[117].mxu0  ;;  %v1643_v52 = vpop.f32.mrb[7].mxu1 }
 0x1d1   : > { %2140 = vst.msk [vmem:[%s3315_s14 + $0x20] sm:$0xff] %vm2135_vm2, %v1641_v46  ;;  %v1144_v53 = vadd.f32 %v3342_v41, %v1143_v51  ;;  %v1644_v54 = vadd.f32 %v3308_v13, %v1643_v52  ;;  %v2722_v55 = vpop.f32.mrb[118].mxu0  ;;  %2845 = vmatprep.mubr.msk.bf16.mxu1 %vm1397_vm1, %v1374_v45 }
 0x1d2   : > { %2143 = vst.msk [vmem:[%s3315_s14 + $0x38] sm:$0xff] %vm2135_vm2, %v1652_v50  ;;  %v1155_v56 = vadd.f32 %v3342_v41, %v2722_v55  ;;  %v1146_v57 = vpop.f32.mrb[119].mxu0  ;;  %2846 = vmatmul.mubr.msk.bf16.gmra.mrb[112].mxu1 %vm1397_vm1, %v1375_v42  ;;  %v1308_v59 = vmax.f32 %v1152_v49, 0.0 }
 0x1d3   : > { %2141 = vst.msk [vmem:[%s3315_s14 + $0x28] sm:$0xff] %vm2135_vm2, %v1644_v54  ;;  %v1147_v58 = vadd.f32 %v3342_v41, %v1146_v57  ;;  %v1306_v61 = vmax.f32 %v1144_v53, 0.0 }
 0x1d4   : > { %v1309_v60 = vmax.f32 %v1155_v56, 0.0 }
 0x1d5   : > { %v1307_v62 = vmax.f32 %v1147_v58, 0.0  ;;  %v2743_v63 = vpop.f32.mrb[8].mxu1 }
 0x1d6   : > { %v1377_v0 = vpack.c.bf16 %v1309_v60, %v1308_v59  ;;  %v1665_v1 = vadd.f32 %v2743_v63, %v3308_v13  ;;  %v1656_v2 = vpop.f32.mrb[9].mxu1 }
 0x1d7   : > { %v1376_v3 = vpack.c.bf16 %v1307_v62, %v1306_v61  ;;  %v1657_v4 = vadd.f32 %v3308_v13, %v1656_v2  ;;  %v2725_v5 = vpop.f32.mrb[120].mxu0  ;;  %v2744_v6 = vpop.f32.mrb[10].mxu1 }
 0x1d8   : > { %2146 = vst.msk [vmem:[%s3315_s14 + $0x50] sm:$0xff] %vm2135_vm2, %v1665_v1  ;;  %v1168_v7 = vadd.f32 %v3342_v41, %v2725_v5  ;;  %v1668_v8 = vadd.f32 %v2744_v6, %v3308_v13  ;;  %v1159_v9 = vpop.f32.mrb[121].mxu0  ;;  %v1659_v10 = vpop.f32.mrb[11].mxu1 }
 0x1d9   : > { %2144 = vst.msk [vmem:[%s3315_s14 + $0x40] sm:$0xff] %vm2135_vm2, %v1657_v4  ;;  %v1160_v11 = vadd.f32 %v3342_v41, %v1159_v9  ;;  %v1660_v12 = vadd.f32 %v3308_v13, %v1659_v10  ;;  %v2726_v14 = vpop.f32.mrb[122].mxu0  ;;  %2849 = vmatprep.mubr.msk.bf16.mxu1 %vm1397_vm1, %v1376_v3 }
 0x1da   : > { %2147 = vst.msk [vmem:[%s3315_s14 + $0x58] sm:$0xff] %vm2135_vm2, %v1668_v8  ;;  %v1171_v15 = vadd.f32 %v3342_v41, %v2726_v14  ;;  %v1162_v16 = vpop.f32.mrb[123].mxu0  ;;  %2850 = vmatmul.mubr.msk.bf16.gmra.mrb[116].mxu1 %vm1397_vm1, %v1377_v0  ;;  %v1312_v18 = vmax.f32 %v1168_v7, 0.0 }
 0x1db   : > { %2145 = vst.msk [vmem:[%s3315_s14 + $0x48] sm:$0xff] %vm2135_vm2, %v1660_v12  ;;  %v1163_v17 = vadd.f32 %v3342_v41, %v1162_v16  ;;  %v1310_v20 = vmax.f32 %v1160_v11, 0.0 }
 0x1dc   : > { %v1313_v19 = vmax.f32 %v1171_v15, 0.0 }
 0x1dd   : > { %v1311_v21 = vmax.f32 %v1163_v17, 0.0  ;;  %v2747_v22 = vpop.f32.mrb[12].mxu1 }
 0x1de   : > { %v1379_v23 = vpack.c.bf16 %v1313_v19, %v1312_v18  ;;  %v1681_v24 = vadd.f32 %v2747_v22, %v3308_v13  ;;  %v1672_v25 = vpop.f32.mrb[13].mxu1 }
 0x1df   : > { %v1378_v26 = vpack.c.bf16 %v1311_v21, %v1310_v20  ;;  %v1673_v27 = vadd.f32 %v3308_v13, %v1672_v25  ;;  %v2729_v28 = vpop.f32.mrb[124].mxu0  ;;  %v2748_v29 = vpop.f32.mrb[14].mxu1 }
 0x1e0   : > { %2150 = vst.msk [vmem:[%s3315_s14 + $0x70] sm:$0xff] %vm2135_vm2, %v1681_v24  ;;  %v1184_v30 = vadd.f32 %v3342_v41, %v2729_v28  ;;  %v1684_v31 = vadd.f32 %v2748_v29, %v3308_v13  ;;  %v1175_v32 = vpop.f32.mrb[125].mxu0  ;;  %v1675_v33 = vpop.f32.mrb[15].mxu1 }
 0x1e1   : > { %2148 = vst.msk [vmem:[%s3315_s14 + $0x60] sm:$0xff] %vm2135_vm2, %v1673_v27  ;;  %v1176_v34 = vadd.f32 %v3342_v41, %v1175_v32  ;;  %v1676_v35 = vadd.f32 %v3308_v13, %v1675_v33  ;;  %v2730_v36 = vpop.f32.mrb[126].mxu0  ;;  %2853 = vmatprep.mubr.msk.bf16.mxu1 %vm1397_vm1, %v1378_v26 }
 0x1e2   : > { %2151 = vst.msk [vmem:[%s3315_s14 + $0x78] sm:$0xff] %vm2135_vm2, %v1684_v31  ;;  %v1187_v37 = vadd.f32 %v3342_v41, %v2730_v36  ;;  %v1178_v38 = vpop.f32.mrb[127].mxu0  ;;  %2854 = vmatmul.mubr.msk.bf16.gmra.mrb[120].mxu1 %vm1397_vm1, %v1379_v23  ;;  %v1316_v40 = vmax.f32 %v1184_v30, 0.0 }
 0x1e3   : > { %2149 = vst.msk [vmem:[%s3315_s14 + $0x68] sm:$0xff] %vm2135_vm2, %v1676_v35  ;;  %v1179_v39 = vadd.f32 %v3342_v41, %v1178_v38  ;;  %v1314_v43 = vmax.f32 %v1176_v34, 0.0 }
 0x1e4   : > { %v1317_v42 = vmax.f32 %v1187_v37, 0.0 }
 0x1e5   : > { %v1315_v44 = vmax.f32 %v1179_v39, 0.0  ;;  %v2751_v45 = vpop.f32.mrb[16].mxu1 }
 0x1e6   : > { %v1381_v46 = vpack.c.bf16 %v1317_v42, %v1316_v40  ;;  %v1697_v47 = vadd.f32 %v2751_v45, %v3308_v13  ;;  %v1688_v48 = vpop.f32.mrb[17].mxu1 }
 0x1e7   : > { %v1380_v49 = vpack.c.bf16 %v1315_v44, %v1314_v43  ;;  %v1689_v50 = vadd.f32 %v3308_v13, %v1688_v48  ;;  %v2752_v51 = vpop.f32.mrb[18].mxu1 }
 0x1e8   : > { %2154 = vst.msk [vmem:[%s3315_s14 + $0x90] sm:$0xff] %vm2135_vm2, %v1697_v47  ;;  %v1700_v41 = vadd.f32 %v2752_v51, %v3308_v13  ;;  %v1691_v52 = vpop.f32.mrb[19].mxu1 }
 0x1e9   : > { %2152 = vst.msk [vmem:[%s3315_s14 + $0x80] sm:$0xff] %vm2135_vm2, %v1689_v50  ;;  %v1692_v53 = vadd.f32 %v3308_v13, %v1691_v52  ;;  %2857 = vmatprep.mubr.msk.bf16.mxu1 %vm1397_vm1, %v1380_v49 }
 0x1ea   : > { %2155 = vst.msk [vmem:[%s3315_s14 + $0x98] sm:$0xff] %vm2135_vm2, %v1700_v41  ;;  %2858 = vmatmul.mubr.msk.bf16.gmra.mrb[124].mxu1 %vm1397_vm1, %v1381_v46 }
 0x1eb   : > { %2153 = vst.msk [vmem:[%s3315_s14 + $0x88] sm:$0xff] %vm2135_vm2, %v1692_v53 }
 0x1ed   : > { %v2755_v54 = vpop.f32.mrb[20].mxu1 }
 0x1ee   : > { %v1713_v55 = vadd.f32 %v2755_v54, %v3308_v13  ;;  %v1704_v56 = vpop.f32.mrb[21].mxu1 }
 0x1ef   : > { %v1705_v57 = vadd.f32 %v3308_v13, %v1704_v56  ;;  %v2756_v58 = vpop.f32.mrb[22].mxu1 }
 0x1f0   : > { %2158 = vst.msk [vmem:[%s3315_s14 + $0xb0] sm:$0xff] %vm2135_vm2, %v1713_v55  ;;  %v1716_v59 = vadd.f32 %v2756_v58, %v3308_v13  ;;  %v1707_v60 = vpop.f32.mrb[23].mxu1 }
 0x1f1   : > { %2156 = vst.msk [vmem:[%s3315_s14 + $0xa0] sm:$0xff] %vm2135_vm2, %v1705_v57  ;;  %v1708_v61 = vadd.f32 %v3308_v13, %v1707_v60 }
 0x1f2   : > { %2159 = vst.msk [vmem:[%s3315_s14 + $0xb8] sm:$0xff] %vm2135_vm2, %v1716_v59 }
 0x1f3   : > { %2157 = vst.msk [vmem:[%s3315_s14 + $0xa8] sm:$0xff] %vm2135_vm2, %v1708_v61 }
 0x1f5   : > { %v2759_v62 = vpop.f32.mrb[24].mxu1 }
 0x1f6   : > { %v1729_v63 = vadd.f32 %v2759_v62, %v3308_v13  ;;  %v1720_v0 = vpop.f32.mrb[25].mxu1 }
 0x1f7   : > { %v1721_v1 = vadd.f32 %v3308_v13, %v1720_v0  ;;  %v2760_v2 = vpop.f32.mrb[26].mxu1 }
 0x1f8   : > { %2162 = vst.msk [vmem:[%s3315_s14 + $0xd0] sm:$0xff] %vm2135_vm2, %v1729_v63  ;;  %v1732_v3 = vadd.f32 %v2760_v2, %v3308_v13  ;;  %v1723_v4 = vpop.f32.mrb[27].mxu1 }
 0x1f9   : > { %2160 = vst.msk [vmem:[%s3315_s14 + $0xc0] sm:$0xff] %vm2135_vm2, %v1721_v1  ;;  %v1724_v5 = vadd.f32 %v3308_v13, %v1723_v4 }
 0x1fa   : > { %2163 = vst.msk [vmem:[%s3315_s14 + $0xd8] sm:$0xff] %vm2135_vm2, %v1732_v3 }
 0x1fb   : > { %2161 = vst.msk [vmem:[%s3315_s14 + $0xc8] sm:$0xff] %vm2135_vm2, %v1724_v5 }
 0x1fd   : > { %v2763_v6 = vpop.f32.mrb[28].mxu1 }
 0x1fe   : > { %v1745_v7 = vadd.f32 %v2763_v6, %v3308_v13  ;;  %v1736_v8 = vpop.f32.mrb[29].mxu1 }
 0x1ff   : > { %v1737_v9 = vadd.f32 %v3308_v13, %v1736_v8  ;;  %v2764_v10 = vpop.f32.mrb[30].mxu1 }
 0x200   : > { %2166 = vst.msk [vmem:[%s3315_s14 + $0xf0] sm:$0xff] %vm2135_vm2, %v1745_v7  ;;  %v1748_v11 = vadd.f32 %v2764_v10, %v3308_v13  ;;  %v1739_v12 = vpop.f32.mrb[31].mxu1 }
 0x201   : > { %2164 = vst.msk [vmem:[%s3315_s14 + $0xe0] sm:$0xff] %vm2135_vm2, %v1737_v9  ;;  %v1740_v14 = vadd.f32 %v3308_v13, %v1739_v12 }
 0x202   : > { %2167 = vst.msk [vmem:[%s3315_s14 + $0xf8] sm:$0xff] %vm2135_vm2, %v1748_v11 }
 0x203   : > { %2165 = vst.msk [vmem:[%s3315_s14 + $0xe8] sm:$0xff] %vm2135_vm2, %v1740_v14 }
 0x205   : > { %v2767_v15 = vpop.f32.mrb[32].mxu1 }
 0x206   : > { %v1761_v16 = vadd.f32 %v2767_v15, %v3308_v13  ;;  %v1752_v17 = vpop.f32.mrb[33].mxu1 }
 0x207   : > { %v1753_v18 = vadd.f32 %v3308_v13, %v1752_v17  ;;  %v2768_v19 = vpop.f32.mrb[34].mxu1 }
 0x208   : > { %2170 = vst.msk [vmem:[%s3315_s14 + $0x110] sm:$0xff] %vm2135_vm2, %v1761_v16  ;;  %v1764_v20 = vadd.f32 %v2768_v19, %v3308_v13  ;;  %v1755_v21 = vpop.f32.mrb[35].mxu1 }
 0x209   : > { %2168 = vst.msk [vmem:[%s3315_s14 + $0x100] sm:$0xff] %vm2135_vm2, %v1753_v18  ;;  %v1756_v22 = vadd.f32 %v3308_v13, %v1755_v21 }
 0x20a   : > { %2171 = vst.msk [vmem:[%s3315_s14 + $0x118] sm:$0xff] %vm2135_vm2, %v1764_v20 }
 0x20b   : > { %2169 = vst.msk [vmem:[%s3315_s14 + $0x108] sm:$0xff] %vm2135_vm2, %v1756_v22 }
 0x20d   : > { %v2771_v23 = vpop.f32.mrb[36].mxu1 }
 0x20e   : > { %v1777_v24 = vadd.f32 %v2771_v23, %v3308_v13  ;;  %v1768_v25 = vpop.f32.mrb[37].mxu1 }
 0x20f   : > { %v1769_v26 = vadd.f32 %v3308_v13, %v1768_v25  ;;  %v2772_v27 = vpop.f32.mrb[38].mxu1 }
 0x210   : > { %2174 = vst.msk [vmem:[%s3315_s14 + $0x130] sm:$0xff] %vm2135_vm2, %v1777_v24  ;;  %v1780_v28 = vadd.f32 %v2772_v27, %v3308_v13  ;;  %v1771_v29 = vpop.f32.mrb[39].mxu1 }
 0x211   : > { %2172 = vst.msk [vmem:[%s3315_s14 + $0x120] sm:$0xff] %vm2135_vm2, %v1769_v26  ;;  %v1772_v30 = vadd.f32 %v3308_v13, %v1771_v29 }
 0x212   : > { %2175 = vst.msk [vmem:[%s3315_s14 + $0x138] sm:$0xff] %vm2135_vm2, %v1780_v28 }
 0x213   : > { %2173 = vst.msk [vmem:[%s3315_s14 + $0x128] sm:$0xff] %vm2135_vm2, %v1772_v30 }
 0x215   : > { %v2775_v31 = vpop.f32.mrb[40].mxu1 }
 0x216   : > { %v1793_v32 = vadd.f32 %v2775_v31, %v3308_v13  ;;  %v1784_v33 = vpop.f32.mrb[41].mxu1 }
 0x217   : > { %v1785_v34 = vadd.f32 %v3308_v13, %v1784_v33  ;;  %v2776_v35 = vpop.f32.mrb[42].mxu1 }
 0x218   : > { %2178 = vst.msk [vmem:[%s3315_s14 + $0x150] sm:$0xff] %vm2135_vm2, %v1793_v32  ;;  %v1796_v36 = vadd.f32 %v2776_v35, %v3308_v13  ;;  %v1787_v37 = vpop.f32.mrb[43].mxu1 }
 0x219   : > { %2176 = vst.msk [vmem:[%s3315_s14 + $0x140] sm:$0xff] %vm2135_vm2, %v1785_v34  ;;  %v1788_v38 = vadd.f32 %v3308_v13, %v1787_v37 }
 0x21a   : > { %2179 = vst.msk [vmem:[%s3315_s14 + $0x158] sm:$0xff] %vm2135_vm2, %v1796_v36 }
 0x21b   : > { %2177 = vst.msk [vmem:[%s3315_s14 + $0x148] sm:$0xff] %vm2135_vm2, %v1788_v38 }
 0x21d   : > { %v2779_v39 = vpop.f32.mrb[44].mxu1 }
 0x21e   : > { %v1809_v40 = vadd.f32 %v2779_v39, %v3308_v13  ;;  %v1800_v42 = vpop.f32.mrb[45].mxu1 }
 0x21f   : > { %v1801_v43 = vadd.f32 %v3308_v13, %v1800_v42  ;;  %v2780_v44 = vpop.f32.mrb[46].mxu1 }
 0x220   : > { %2182 = vst.msk [vmem:[%s3315_s14 + $0x170] sm:$0xff] %vm2135_vm2, %v1809_v40  ;;  %v1812_v45 = vadd.f32 %v2780_v44, %v3308_v13  ;;  %v1803_v46 = vpop.f32.mrb[47].mxu1 }
 0x221   : > { %2180 = vst.msk [vmem:[%s3315_s14 + $0x160] sm:$0xff] %vm2135_vm2, %v1801_v43  ;;  %v1804_v47 = vadd.f32 %v3308_v13, %v1803_v46 }
 0x222   : > { %2183 = vst.msk [vmem:[%s3315_s14 + $0x178] sm:$0xff] %vm2135_vm2, %v1812_v45 }
 0x223   : > { %2181 = vst.msk [vmem:[%s3315_s14 + $0x168] sm:$0xff] %vm2135_vm2, %v1804_v47 }
 0x225   : > { %v2783_v48 = vpop.f32.mrb[48].mxu1 }
 0x226   : > { %v1825_v49 = vadd.f32 %v2783_v48, %v3308_v13  ;;  %v1816_v50 = vpop.f32.mrb[49].mxu1 }
 0x227   : > { %v1817_v51 = vadd.f32 %v3308_v13, %v1816_v50  ;;  %v2784_v41 = vpop.f32.mrb[50].mxu1 }
 0x228   : > { %2186 = vst.msk [vmem:[%s3315_s14 + $0x190] sm:$0xff] %vm2135_vm2, %v1825_v49  ;;  %v1828_v52 = vadd.f32 %v2784_v41, %v3308_v13  ;;  %v1819_v53 = vpop.f32.mrb[51].mxu1 }
 0x229   : > { %2184 = vst.msk [vmem:[%s3315_s14 + $0x180] sm:$0xff] %vm2135_vm2, %v1817_v51  ;;  %v1820_v54 = vadd.f32 %v3308_v13, %v1819_v53 }
 0x22a   : > { %2187 = vst.msk [vmem:[%s3315_s14 + $0x198] sm:$0xff] %vm2135_vm2, %v1828_v52 }
 0x22b   : > { %2185 = vst.msk [vmem:[%s3315_s14 + $0x188] sm:$0xff] %vm2135_vm2, %v1820_v54 }
 0x22d   : > { %v2787_v55 = vpop.f32.mrb[52].mxu1 }
 0x22e   : > { %v1841_v56 = vadd.f32 %v2787_v55, %v3308_v13  ;;  %v1832_v57 = vpop.f32.mrb[53].mxu1 }
 0x22f   : > { %v1833_v58 = vadd.f32 %v3308_v13, %v1832_v57  ;;  %v2788_v59 = vpop.f32.mrb[54].mxu1 }
 0x230   : > { %2190 = vst.msk [vmem:[%s3315_s14 + $0x1b0] sm:$0xff] %vm2135_vm2, %v1841_v56  ;;  %v1844_v60 = vadd.f32 %v2788_v59, %v3308_v13  ;;  %v1835_v61 = vpop.f32.mrb[55].mxu1 }
 0x231   : > { %2188 = vst.msk [vmem:[%s3315_s14 + $0x1a0] sm:$0xff] %vm2135_vm2, %v1833_v58  ;;  %v1836_v62 = vadd.f32 %v3308_v13, %v1835_v61 }
 0x232   : > { %2191 = vst.msk [vmem:[%s3315_s14 + $0x1b8] sm:$0xff] %vm2135_vm2, %v1844_v60 }
 0x233   : > { %2189 = vst.msk [vmem:[%s3315_s14 + $0x1a8] sm:$0xff] %vm2135_vm2, %v1836_v62 }
 0x235   : > { %v2791_v63 = vpop.f32.mrb[56].mxu1 }
 0x236   : > { %v1857_v0 = vadd.f32 %v2791_v63, %v3308_v13  ;;  %v1848_v1 = vpop.f32.mrb[57].mxu1 }
 0x237   : > { %v1849_v2 = vadd.f32 %v3308_v13, %v1848_v1  ;;  %v2792_v3 = vpop.f32.mrb[58].mxu1 }
 0x238   : > { %2194 = vst.msk [vmem:[%s3315_s14 + $0x1d0] sm:$0xff] %vm2135_vm2, %v1857_v0  ;;  %v1860_v4 = vadd.f32 %v2792_v3, %v3308_v13  ;;  %v1851_v5 = vpop.f32.mrb[59].mxu1 }
 0x239   : > { %2192 = vst.msk [vmem:[%s3315_s14 + $0x1c0] sm:$0xff] %vm2135_vm2, %v1849_v2  ;;  %v1852_v6 = vadd.f32 %v3308_v13, %v1851_v5 }
 0x23a   : > { %2195 = vst.msk [vmem:[%s3315_s14 + $0x1d8] sm:$0xff] %vm2135_vm2, %v1860_v4 }
 0x23b   : > { %2193 = vst.msk [vmem:[%s3315_s14 + $0x1c8] sm:$0xff] %vm2135_vm2, %v1852_v6 }
 0x23d   : > { %v2795_v7 = vpop.f32.mrb[60].mxu1 }
 0x23e   : > { %v1873_v8 = vadd.f32 %v2795_v7, %v3308_v13  ;;  %v1864_v9 = vpop.f32.mrb[61].mxu1 }
 0x23f   : > { %v1865_v10 = vadd.f32 %v3308_v13, %v1864_v9  ;;  %v2796_v11 = vpop.f32.mrb[62].mxu1 }
 0x240   : > { %2198 = vst.msk [vmem:[%s3315_s14 + $0x1f0] sm:$0xff] %vm2135_vm2, %v1873_v8  ;;  %v1876_v12 = vadd.f32 %v2796_v11, %v3308_v13  ;;  %v1867_v14 = vpop.f32.mrb[63].mxu1 }
 0x241   : > { %2196 = vst.msk [vmem:[%s3315_s14 + $0x1e0] sm:$0xff] %vm2135_vm2, %v1865_v10  ;;  %v1868_v15 = vadd.f32 %v3308_v13, %v1867_v14 }
 0x242   : > { %2199 = vst.msk [vmem:[%s3315_s14 + $0x1f8] sm:$0xff] %vm2135_vm2, %v1876_v12 }
 0x243   : > { %2197 = vst.msk [vmem:[%s3315_s14 + $0x1e8] sm:$0xff] %vm2135_vm2, %v1868_v15 }
 0x245   : > { %v2799_v16 = vpop.f32.mrb[64].mxu1 }
 0x246   : > { %v1889_v17 = vadd.f32 %v2799_v16, %v3308_v13  ;;  %v1880_v18 = vpop.f32.mrb[65].mxu1 }
 0x247   : > { %v1881_v19 = vadd.f32 %v3308_v13, %v1880_v18  ;;  %v2800_v20 = vpop.f32.mrb[66].mxu1 }
 0x248   : > { %2202 = vst.msk [vmem:[%s3315_s14 + $0x210] sm:$0xff] %vm2135_vm2, %v1889_v17  ;;  %v1892_v21 = vadd.f32 %v2800_v20, %v3308_v13  ;;  %v1883_v22 = vpop.f32.mrb[67].mxu1 }
 0x249   : > { %2200 = vst.msk [vmem:[%s3315_s14 + $0x200] sm:$0xff] %vm2135_vm2, %v1881_v19  ;;  %v1884_v23 = vadd.f32 %v3308_v13, %v1883_v22 }
 0x24a   : > { %2203 = vst.msk [vmem:[%s3315_s14 + $0x218] sm:$0xff] %vm2135_vm2, %v1892_v21 }
 0x24b   : > { %2201 = vst.msk [vmem:[%s3315_s14 + $0x208] sm:$0xff] %vm2135_vm2, %v1884_v23 }
 0x24d   : > { %v2803_v24 = vpop.f32.mrb[68].mxu1 }
 0x24e   : > { %v1905_v25 = vadd.f32 %v2803_v24, %v3308_v13  ;;  %v1896_v26 = vpop.f32.mrb[69].mxu1 }
 0x24f   : > { %v1897_v27 = vadd.f32 %v3308_v13, %v1896_v26  ;;  %v2804_v28 = vpop.f32.mrb[70].mxu1 }
 0x250   : > { %2206 = vst.msk [vmem:[%s3315_s14 + $0x230] sm:$0xff] %vm2135_vm2, %v1905_v25  ;;  %v1908_v29 = vadd.f32 %v2804_v28, %v3308_v13  ;;  %v1899_v30 = vpop.f32.mrb[71].mxu1 }
 0x251   : > { %2204 = vst.msk [vmem:[%s3315_s14 + $0x220] sm:$0xff] %vm2135_vm2, %v1897_v27  ;;  %v1900_v31 = vadd.f32 %v3308_v13, %v1899_v30 }
 0x252   : > { %2207 = vst.msk [vmem:[%s3315_s14 + $0x238] sm:$0xff] %vm2135_vm2, %v1908_v29 }
 0x253   : > { %2205 = vst.msk [vmem:[%s3315_s14 + $0x228] sm:$0xff] %vm2135_vm2, %v1900_v31 }
 0x255   : > { %v2807_v32 = vpop.f32.mrb[72].mxu1 }
 0x256   : > { %v1921_v33 = vadd.f32 %v2807_v32, %v3308_v13  ;;  %v1912_v34 = vpop.f32.mrb[73].mxu1 }
 0x257   : > { %v1913_v35 = vadd.f32 %v3308_v13, %v1912_v34  ;;  %v2808_v36 = vpop.f32.mrb[74].mxu1 }
 0x258   : > { %2210 = vst.msk [vmem:[%s3315_s14 + $0x250] sm:$0xff] %vm2135_vm2, %v1921_v33  ;;  %v1924_v37 = vadd.f32 %v2808_v36, %v3308_v13  ;;  %v1915_v38 = vpop.f32.mrb[75].mxu1 }
 0x259   : > { %2208 = vst.msk [vmem:[%s3315_s14 + $0x240] sm:$0xff] %vm2135_vm2, %v1913_v35  ;;  %v1916_v39 = vadd.f32 %v3308_v13, %v1915_v38 }
 0x25a   : > { %2211 = vst.msk [vmem:[%s3315_s14 + $0x258] sm:$0xff] %vm2135_vm2, %v1924_v37 }
 0x25b   : > { %2209 = vst.msk [vmem:[%s3315_s14 + $0x248] sm:$0xff] %vm2135_vm2, %v1916_v39 }
 0x25d   : > { %v2811_v40 = vpop.f32.mrb[76].mxu1 }
 0x25e   : > { %v1937_v42 = vadd.f32 %v2811_v40, %v3308_v13  ;;  %v1928_v43 = vpop.f32.mrb[77].mxu1 }
 0x25f   : > { %v1929_v44 = vadd.f32 %v3308_v13, %v1928_v43  ;;  %v2812_v45 = vpop.f32.mrb[78].mxu1 }
 0x260   : > { %2214 = vst.msk [vmem:[%s3315_s14 + $0x270] sm:$0xff] %vm2135_vm2, %v1937_v42  ;;  %v1940_v46 = vadd.f32 %v2812_v45, %v3308_v13  ;;  %v1931_v47 = vpop.f32.mrb[79].mxu1 }
 0x261   : > { %2212 = vst.msk [vmem:[%s3315_s14 + $0x260] sm:$0xff] %vm2135_vm2, %v1929_v44  ;;  %v1932_v48 = vadd.f32 %v3308_v13, %v1931_v47 }
 0x262   : > { %2215 = vst.msk [vmem:[%s3315_s14 + $0x278] sm:$0xff] %vm2135_vm2, %v1940_v46 }
 0x263   : > { %2213 = vst.msk [vmem:[%s3315_s14 + $0x268] sm:$0xff] %vm2135_vm2, %v1932_v48 }
 0x265   : > { %v2815_v49 = vpop.f32.mrb[80].mxu1 }
 0x266   : > { %v1953_v50 = vadd.f32 %v2815_v49, %v3308_v13  ;;  %v1944_v51 = vpop.f32.mrb[81].mxu1 }
 0x267   : > { %v1945_v41 = vadd.f32 %v3308_v13, %v1944_v51  ;;  %v2816_v52 = vpop.f32.mrb[82].mxu1 }
 0x268   : > { %2218 = vst.msk [vmem:[%s3315_s14 + $0x290] sm:$0xff] %vm2135_vm2, %v1953_v50  ;;  %v1956_v53 = vadd.f32 %v2816_v52, %v3308_v13  ;;  %v1947_v54 = vpop.f32.mrb[83].mxu1 }
 0x269   : > { %2216 = vst.msk [vmem:[%s3315_s14 + $0x280] sm:$0xff] %vm2135_vm2, %v1945_v41  ;;  %v1948_v55 = vadd.f32 %v3308_v13, %v1947_v54 }
 0x26a   : > { %2219 = vst.msk [vmem:[%s3315_s14 + $0x298] sm:$0xff] %vm2135_vm2, %v1956_v53 }
 0x26b   : > { %2217 = vst.msk [vmem:[%s3315_s14 + $0x288] sm:$0xff] %vm2135_vm2, %v1948_v55 }
 0x26d   : > { %v2819_v56 = vpop.f32.mrb[84].mxu1 }
 0x26e   : > { %v1969_v57 = vadd.f32 %v2819_v56, %v3308_v13  ;;  %v1960_v58 = vpop.f32.mrb[85].mxu1 }
 0x26f   : > { %v1961_v59 = vadd.f32 %v3308_v13, %v1960_v58  ;;  %v2820_v60 = vpop.f32.mrb[86].mxu1 }
 0x270   : > { %2222 = vst.msk [vmem:[%s3315_s14 + $0x2b0] sm:$0xff] %vm2135_vm2, %v1969_v57  ;;  %v1972_v61 = vadd.f32 %v2820_v60, %v3308_v13  ;;  %v1963_v62 = vpop.f32.mrb[87].mxu1 }
 0x271   : > { %2220 = vst.msk [vmem:[%s3315_s14 + $0x2a0] sm:$0xff] %vm2135_vm2, %v1961_v59  ;;  %v1964_v63 = vadd.f32 %v3308_v13, %v1963_v62 }
 0x272   : > { %2223 = vst.msk [vmem:[%s3315_s14 + $0x2b8] sm:$0xff] %vm2135_vm2, %v1972_v61 }
 0x273   : > { %2221 = vst.msk [vmem:[%s3315_s14 + $0x2a8] sm:$0xff] %vm2135_vm2, %v1964_v63 }
 0x275   : > { %v2823_v0 = vpop.f32.mrb[88].mxu1 }
 0x276   : > { %v1985_v1 = vadd.f32 %v2823_v0, %v3308_v13  ;;  %v1976_v2 = vpop.f32.mrb[89].mxu1 }
 0x277   : > { %v1977_v3 = vadd.f32 %v3308_v13, %v1976_v2  ;;  %v2824_v4 = vpop.f32.mrb[90].mxu1 }
 0x278   : > { %2226 = vst.msk [vmem:[%s3315_s14 + $0x2d0] sm:$0xff] %vm2135_vm2, %v1985_v1  ;;  %v1988_v5 = vadd.f32 %v2824_v4, %v3308_v13  ;;  %v1979_v6 = vpop.f32.mrb[91].mxu1 }
 0x279   : > { %2224 = vst.msk [vmem:[%s3315_s14 + $0x2c0] sm:$0xff] %vm2135_vm2, %v1977_v3  ;;  %v1980_v7 = vadd.f32 %v3308_v13, %v1979_v6 }
 0x27a   : > { %2227 = vst.msk [vmem:[%s3315_s14 + $0x2d8] sm:$0xff] %vm2135_vm2, %v1988_v5 }
 0x27b   : > { %2225 = vst.msk [vmem:[%s3315_s14 + $0x2c8] sm:$0xff] %vm2135_vm2, %v1980_v7 }
 0x27d   : > { %v2827_v8 = vpop.f32.mrb[92].mxu1 }
 0x27e   : > { %v2001_v9 = vadd.f32 %v2827_v8, %v3308_v13  ;;  %v1992_v10 = vpop.f32.mrb[93].mxu1 }
 0x27f   : > { %v1993_v11 = vadd.f32 %v3308_v13, %v1992_v10  ;;  %v2828_v12 = vpop.f32.mrb[94].mxu1 }
 0x280   : > { %2230 = vst.msk [vmem:[%s3315_s14 + $0x2f0] sm:$0xff] %vm2135_vm2, %v2001_v9  ;;  %v2004_v14 = vadd.f32 %v2828_v12, %v3308_v13  ;;  %v1995_v15 = vpop.f32.mrb[95].mxu1 }
 0x281   : > { %2228 = vst.msk [vmem:[%s3315_s14 + $0x2e0] sm:$0xff] %vm2135_vm2, %v1993_v11  ;;  %v1996_v16 = vadd.f32 %v3308_v13, %v1995_v15 }
 0x282   : > { %2231 = vst.msk [vmem:[%s3315_s14 + $0x2f8] sm:$0xff] %vm2135_vm2, %v2004_v14 }
 0x283   : > { %2229 = vst.msk [vmem:[%s3315_s14 + $0x2e8] sm:$0xff] %vm2135_vm2, %v1996_v16 }
 0x285   : > { %v2831_v17 = vpop.f32.mrb[96].mxu1 }
 0x286   : > { %v2017_v18 = vadd.f32 %v2831_v17, %v3308_v13  ;;  %v2008_v19 = vpop.f32.mrb[97].mxu1 }
 0x287   : > { %v2009_v20 = vadd.f32 %v3308_v13, %v2008_v19  ;;  %v2832_v21 = vpop.f32.mrb[98].mxu1 }
 0x288   : > { %2234 = vst.msk [vmem:[%s3315_s14 + $0x310] sm:$0xff] %vm2135_vm2, %v2017_v18  ;;  %v2020_v22 = vadd.f32 %v2832_v21, %v3308_v13  ;;  %v2011_v23 = vpop.f32.mrb[99].mxu1 }
 0x289   : > { %2232 = vst.msk [vmem:[%s3315_s14 + $0x300] sm:$0xff] %vm2135_vm2, %v2009_v20  ;;  %v2012_v24 = vadd.f32 %v3308_v13, %v2011_v23 }
 0x28a   : > { %2235 = vst.msk [vmem:[%s3315_s14 + $0x318] sm:$0xff] %vm2135_vm2, %v2020_v22 }
 0x28b   : > { %2233 = vst.msk [vmem:[%s3315_s14 + $0x308] sm:$0xff] %vm2135_vm2, %v2012_v24 }
 0x28d   : > { %v2835_v25 = vpop.f32.mrb[100].mxu1 }
 0x28e   : > { %v2033_v26 = vadd.f32 %v2835_v25, %v3308_v13  ;;  %v2024_v27 = vpop.f32.mrb[101].mxu1 }
 0x28f   : > { %v2025_v28 = vadd.f32 %v3308_v13, %v2024_v27  ;;  %v2836_v29 = vpop.f32.mrb[102].mxu1 }
 0x290   : > { %2238 = vst.msk [vmem:[%s3315_s14 + $0x330] sm:$0xff] %vm2135_vm2, %v2033_v26  ;;  %v2036_v30 = vadd.f32 %v2836_v29, %v3308_v13  ;;  %v2027_v31 = vpop.f32.mrb[103].mxu1 }
 0x291   : > { %2236 = vst.msk [vmem:[%s3315_s14 + $0x320] sm:$0xff] %vm2135_vm2, %v2025_v28  ;;  %v2028_v32 = vadd.f32 %v3308_v13, %v2027_v31 }
 0x292   : > { %2239 = vst.msk [vmem:[%s3315_s14 + $0x338] sm:$0xff] %vm2135_vm2, %v2036_v30 }
 0x293   : > { %2237 = vst.msk [vmem:[%s3315_s14 + $0x328] sm:$0xff] %vm2135_vm2, %v2028_v32 }
 0x295   : > { %v2839_v33 = vpop.f32.mrb[104].mxu1 }
 0x296   : > { %v2049_v34 = vadd.f32 %v2839_v33, %v3308_v13  ;;  %v2040_v35 = vpop.f32.mrb[105].mxu1 }
 0x297   : > { %v2041_v36 = vadd.f32 %v3308_v13, %v2040_v35  ;;  %v2840_v37 = vpop.f32.mrb[106].mxu1 }
 0x298   : > { %2242 = vst.msk [vmem:[%s3315_s14 + $0x350] sm:$0xff] %vm2135_vm2, %v2049_v34  ;;  %v2052_v38 = vadd.f32 %v2840_v37, %v3308_v13  ;;  %v2043_v39 = vpop.f32.mrb[107].mxu1 }
 0x299   : > { %2240 = vst.msk [vmem:[%s3315_s14 + $0x340] sm:$0xff] %vm2135_vm2, %v2041_v36  ;;  %v2044_v40 = vadd.f32 %v3308_v13, %v2043_v39 }
 0x29a   : > { %2243 = vst.msk [vmem:[%s3315_s14 + $0x358] sm:$0xff] %vm2135_vm2, %v2052_v38 }
 0x29b   : > { %2241 = vst.msk [vmem:[%s3315_s14 + $0x348] sm:$0xff] %vm2135_vm2, %v2044_v40 }
 0x29d   : > { %v2843_v42 = vpop.f32.mrb[108].mxu1 }
 0x29e   : > { %v2065_v43 = vadd.f32 %v2843_v42, %v3308_v13  ;;  %v2056_v44 = vpop.f32.mrb[109].mxu1 }
 0x29f   : > { %v2057_v45 = vadd.f32 %v3308_v13, %v2056_v44  ;;  %v2844_v46 = vpop.f32.mrb[110].mxu1 }
 0x2a0   : > { %2246 = vst.msk [vmem:[%s3315_s14 + $0x370] sm:$0xff] %vm2135_vm2, %v2065_v43  ;;  %v2068_v47 = vadd.f32 %v2844_v46, %v3308_v13  ;;  %v2059_v48 = vpop.f32.mrb[111].mxu1 }
 0x2a1   : > { %2244 = vst.msk [vmem:[%s3315_s14 + $0x360] sm:$0xff] %vm2135_vm2, %v2057_v45  ;;  %v2060_v49 = vadd.f32 %v3308_v13, %v2059_v48 }
 0x2a2   : > { %2247 = vst.msk [vmem:[%s3315_s14 + $0x378] sm:$0xff] %vm2135_vm2, %v2068_v47 }
 0x2a3   : > { %2245 = vst.msk [vmem:[%s3315_s14 + $0x368] sm:$0xff] %vm2135_vm2, %v2060_v49 }
 0x2a5   : > { %v2847_v50 = vpop.f32.mrb[112].mxu1 }
 0x2a6   : > { %v2081_v51 = vadd.f32 %v2847_v50, %v3308_v13  ;;  %v2072_v41 = vpop.f32.mrb[113].mxu1 }
 0x2a7   : > { %v2073_v52 = vadd.f32 %v3308_v13, %v2072_v41  ;;  %v2848_v53 = vpop.f32.mrb[114].mxu1 }
 0x2a8   : > { %2250 = vst.msk [vmem:[%s3315_s14 + $0x390] sm:$0xff] %vm2135_vm2, %v2081_v51  ;;  %v2084_v54 = vadd.f32 %v2848_v53, %v3308_v13  ;;  %v2075_v55 = vpop.f32.mrb[115].mxu1 }
 0x2a9   : > { %2248 = vst.msk [vmem:[%s3315_s14 + $0x380] sm:$0xff] %vm2135_vm2, %v2073_v52  ;;  %v2076_v56 = vadd.f32 %v3308_v13, %v2075_v55 }
 0x2aa   : > { %2251 = vst.msk [vmem:[%s3315_s14 + $0x398] sm:$0xff] %vm2135_vm2, %v2084_v54 }
 0x2ab   : > { %2249 = vst.msk [vmem:[%s3315_s14 + $0x388] sm:$0xff] %vm2135_vm2, %v2076_v56 }
 0x2ad   : > { %v2851_v57 = vpop.f32.mrb[116].mxu1 }
 0x2ae   : > { %v2097_v58 = vadd.f32 %v2851_v57, %v3308_v13  ;;  %v2088_v59 = vpop.f32.mrb[117].mxu1 }
 0x2af   : > { %v2089_v60 = vadd.f32 %v3308_v13, %v2088_v59  ;;  %v2852_v61 = vpop.f32.mrb[118].mxu1 }
 0x2b0   : > { %2254 = vst.msk [vmem:[%s3315_s14 + $0x3b0] sm:$0xff] %vm2135_vm2, %v2097_v58  ;;  %v2100_v62 = vadd.f32 %v2852_v61, %v3308_v13  ;;  %v2091_v63 = vpop.f32.mrb[119].mxu1 }
 0x2b1   : > { %2252 = vst.msk [vmem:[%s3315_s14 + $0x3a0] sm:$0xff] %vm2135_vm2, %v2089_v60  ;;  %v2092_v0 = vadd.f32 %v3308_v13, %v2091_v63 }
 0x2b2   : > { %2255 = vst.msk [vmem:[%s3315_s14 + $0x3b8] sm:$0xff] %vm2135_vm2, %v2100_v62 }
 0x2b3   : > { %2253 = vst.msk [vmem:[%s3315_s14 + $0x3a8] sm:$0xff] %vm2135_vm2, %v2092_v0 }
 0x2b5   : > { %v2855_v1 = vpop.f32.mrb[120].mxu1 }
 0x2b6   : > { %v2113_v2 = vadd.f32 %v2855_v1, %v3308_v13  ;;  %v2104_v3 = vpop.f32.mrb[121].mxu1 }
 0x2b7   : > { %v2105_v4 = vadd.f32 %v3308_v13, %v2104_v3  ;;  %v2856_v5 = vpop.f32.mrb[122].mxu1 }
 0x2b8   : > { %2258 = vst.msk [vmem:[%s3315_s14 + $0x3d0] sm:$0xff] %vm2135_vm2, %v2113_v2  ;;  %v2116_v6 = vadd.f32 %v2856_v5, %v3308_v13  ;;  %v2107_v7 = vpop.f32.mrb[123].mxu1 }
 0x2b9   : > { %2256 = vst.msk [vmem:[%s3315_s14 + $0x3c0] sm:$0xff] %vm2135_vm2, %v2105_v4  ;;  %v2108_v8 = vadd.f32 %v3308_v13, %v2107_v7 }
 0x2ba   : > { %2259 = vst.msk [vmem:[%s3315_s14 + $0x3d8] sm:$0xff] %vm2135_vm2, %v2116_v6 }
 0x2bb   : > { %2257 = vst.msk [vmem:[%s3315_s14 + $0x3c8] sm:$0xff] %vm2135_vm2, %v2108_v8 }
 0x2bd   : > { %v2859_v9 = vpop.f32.mrb[124].mxu1 }
 0x2be   : > { %v2129_v10 = vadd.f32 %v2859_v9, %v3308_v13  ;;  %v2120_v11 = vpop.f32.mrb[125].mxu1 }
 0x2bf   : > { %v2121_v12 = vadd.f32 %v3308_v13, %v2120_v11  ;;  %v2860_v14 = vpop.f32.mrb[126].mxu1 }
 0x2c0   : > { %2262 = vst.msk [vmem:[%s3315_s14 + $0x3f0] sm:$0xff] %vm2135_vm2, %v2129_v10  ;;  %v2132_v15 = vadd.f32 %v2860_v14, %v3308_v13  ;;  %v2123_v16 = vpop.f32.mrb[127].mxu1 }
 0x2c1   : > { %2260 = vst.msk [vmem:[%s3315_s14 + $0x3e0] sm:$0xff] %vm2135_vm2, %v2121_v12  ;;  %v2124_v17 = vadd.f32 %v3308_v13, %v2123_v16 }
 0x2c2   : > { %2263 = vst.msk [vmem:[%s3315_s14 + $0x3f8] sm:$0xff] %vm2135_vm2, %v2132_v15 }
 0x2c3   : > { %2261 = vst.msk [vmem:[%s3315_s14 + $0x3e8] sm:$0xff] %vm2135_vm2, %v2124_v17 }
 0x2c4 PF: > { %s15_s18 = sadd.s32 1, %s2880_s18  }
 0x2c5   : > { %p12_p4 = scmp.ge.s32.totalorder %s15_s18, 4  }
 0x2c7   :  { %14 = sbr.rel (!%p12_p4) target bundleno = 1 (0x1), region = 70 }

</bundles_post_ra>
